<compile_context>
chip_gen: v7x
topology: tpu7x:2x2x1
jax: 0.10.0
libtpu: 0.0.40
codegen_flags: <defaults>
</compile_context>

<pallas_src>
import jax
import jax.numpy as jnp
from jax import lax
from jax.experimental import pallas as pl
from jax.experimental.pallas import tpu as pltpu


# ---------------------------------------------------------------------------
# helpers
# ---------------------------------------------------------------------------

_VMEM_LIMIT = 48 * 1024 * 1024  # fits v7x's 64 MiB physical VMEM with headroom


def _round_up(x, m):
    return ((x + m - 1) // m) * m


def _pick_tile(dim, max_tile):
    # Biggest lane-aligned tile not exceeding max_tile nor the padded dim.
    return min(max_tile, _round_up(dim, 128))


# ---------------------------------------------------------------------------
# Pallas kernel 1: tiled matmul + bias + ReLU  (all conv / deconv layers)
# ---------------------------------------------------------------------------

def _mm_bias_relu_kernel(x_ref, w_ref, b_ref, o_ref, acc_ref):
    k = pl.program_id(2)

    @pl.when(k == 0)
    def _():
        acc_ref[...] = jnp.zeros_like(acc_ref)

    acc_ref[...] += jnp.dot(x_ref[...], w_ref[...],
                            preferred_element_type=jnp.float32)

    @pl.when(k == pl.num_programs(2) - 1)
    def _():
        o_ref[...] = jnp.maximum(acc_ref[...] + b_ref[...], 0.0)


def matmul_bias_relu(x2d, w2d, b):
    """relu(x2d @ w2d + b) with bf16 MXU operands and f32 accumulation.

    x2d: [M, K] f32, w2d: [K, N] f32, b: [N] f32  ->  [M, N] f32
    Operands are zero-padded to (8,128)-aligned, lane-dense tiles.
    """
    M, K = x2d.shape
    K2, N = w2d.shape
    assert K2 == K

    tm = _pick_tile(M, 512)
    tn = _pick_tile(N, 256)
    tk = _pick_tile(K, 512)
    Mp, Np, Kp = _round_up(M, tm), _round_up(N, tn), _round_up(K, tk)

    x_p = jnp.pad(x2d.astype(jnp.bfloat16), ((0, Mp - M), (0, Kp - K)))
    w_p = jnp.pad(w2d.astype(jnp.bfloat16), ((0, Kp - K), (0, Np - N)))
    b_p = jnp.pad(b.astype(jnp.float32), (0, Np - N)).reshape(1, Np)

    grid = (Mp // tm, Np // tn, Kp // tk)
    out = pl.pallas_call(
        _mm_bias_relu_kernel,
        out_shape=jax.ShapeDtypeStruct((Mp, Np), jnp.float32),
        grid_spec=pltpu.PrefetchScalarGridSpec(
            num_scalar_prefetch=0,
            grid=grid,
            in_specs=[
                pl.BlockSpec((tm, tk), lambda i, j, k: (i, k)),
                pl.BlockSpec((tk, tn), lambda i, j, k: (k, j)),
                pl.BlockSpec((1, tn), lambda i, j, k: (0, j)),
            ],
            out_specs=pl.BlockSpec((tm, tn), lambda i, j, k: (i, j)),
            scratch_shapes=[pltpu.VMEM((tm, tn), jnp.float32)],
        ),
        compiler_params=pltpu.CompilerParams(
            dimension_semantics=("parallel", "parallel", "arbitrary"),
            vmem_limit_bytes=_VMEM_LIMIT,
        ),
    )(x_p, w_p, b_p)
    return out[:M, :N]


# ---------------------------------------------------------------------------
# Pallas kernel 2: tiled self-expression  y = (C - diag(diag(C))) @ Z
# ---------------------------------------------------------------------------

def _self_expr_kernel(c_ref, z_ref, o_ref, acc_ref):
    i = pl.program_id(0)
    k = pl.program_id(2)

    @pl.when(k == 0)
    def _():
        acc_ref[...] = jnp.zeros_like(acc_ref)

    c = c_ref[...]
    # Block-local diagonal mask. Row-tile and K-tile sizes are equal, so the
    # global diagonal can only intersect blocks with i == k; elsewhere the mask
    # is all-False and the select is a cheap VPU no-op hidden under the MXU.
    rows = lax.broadcasted_iota(jnp.int32, c.shape, 0)
    cols = lax.broadcasted_iota(jnp.int32, c.shape, 1)
    mask = jnp.logical_and(i == k, rows == cols)
    c = jnp.where(mask, jnp.zeros_like(c), c)

    acc_ref[...] += jnp.dot(c, z_ref[...], preferred_element_type=jnp.float32)

    @pl.when(k == pl.num_programs(2) - 1)
    def _():
        o_ref[...] = acc_ref[...]


def self_expression(c, z):
    n, d = z.shape
    tm = _pick_tile(n, 256)
    tk = tm                       # equal row / K tiles => diagonal only when i == k
    tn = _pick_tile(d, 256)
    n_pad = _round_up(n, tm)
    d_pad = _round_up(d, tn)

    c_p = jnp.pad(c.astype(jnp.bfloat16), ((0, n_pad - n), (0, n_pad - n)))
    z_p = jnp.pad(z.astype(jnp.bfloat16), ((0, n_pad - n), (0, d_pad - d)))

    grid = (n_pad // tm, d_pad // tn, n_pad // tk)
    out = pl.pallas_call(
        _self_expr_kernel,
        out_shape=jax.ShapeDtypeStruct((n_pad, d_pad), jnp.float32),
        grid_spec=pltpu.PrefetchScalarGridSpec(
            num_scalar_prefetch=0,
            grid=grid,
            in_specs=[
                pl.BlockSpec((tm, tk), lambda i, j, k: (i, k)),
                pl.BlockSpec((tk, tn), lambda i, j, k: (k, j)),
            ],
            out_specs=pl.BlockSpec((tm, tn), lambda i, j, k: (i, j)),
            scratch_shapes=[pltpu.VMEM((tm, tn), jnp.float32)],
        ),
        compiler_params=pltpu.CompilerParams(
            dimension_semantics=("parallel", "parallel", "arbitrary"),
            vmem_limit_bytes=_VMEM_LIMIT,
        ),
    )(c_p, z_p)
    return out[:n, :d]


# ---------------------------------------------------------------------------
# NHWC conv / conv-transpose wrappers driving the Pallas matmul kernel
# ---------------------------------------------------------------------------

def conv2d_relu_nhwc(x_nhwc, w, b, stride=2, padding=1):
    """PyTorch Conv2d(k=3, stride=2, pad=1) + ReLU, NHWC activations.

    w: [C_out, C_in, kh, kw] (PyTorch layout).
    """
    N, H, W, C = x_nhwc.shape
    C_out, C_in, kh, kw = w.shape
    x_pad = jnp.pad(x_nhwc, ((0, 0), (padding, padding), (padding, padding), (0, 0)))
    Ho = (H + 2 * padding - kh) // stride + 1
    Wo = (W + 2 * padding - kw) // stride + 1
    # patch ordering (kh, kw, C); single concat, no 5-D transpose
    cols = [x_pad[:, i:i + stride * Ho:stride, j:j + stride * Wo:stride, :]
            for i in range(kh) for j in range(kw)]
    patches = jnp.concatenate(cols, axis=-1)           # [N, Ho, Wo, kh*kw*C]
    x2d = patches.reshape(N * Ho * Wo, kh * kw * C)
    w2d = jnp.transpose(w, (2, 3, 1, 0)).reshape(kh * kw * C_in, C_out)
    y2d = matmul_bias_relu(x2d, w2d, b)
    return y2d.reshape(N, Ho, Wo, C_out)


def conv_transpose2d_relu_nhwc(x_nhwc, w_t, b):
    """PyTorch ConvTranspose2d(k=3, stride=2, pad=1, output_pad=1) + ReLU, NHWC.

    Sub-pixel (phase) decomposition: output (2i+p, 2j+q) only depends on input
    taps (i+di, j+dj), di,dj in {0,1}, so the whole layer is one matmul of the
    4-tap patch matrix against a phase-stacked [4*C_in, 4*C_out] weight.
    w_t: [C_in, C_out, 3, 3] (PyTorch ConvTranspose2d layout).
    """
    N, H, W, C = x_nhwc.shape
    C_in, C_out, kh, kw = w_t.shape

    # 4-tap patches (zero pad one row/col on the high side for the boundary taps)
    x_pad = jnp.pad(x_nhwc, ((0, 0), (0, 1), (0, 1), (0, 0)))
    taps = [x_pad[:, di:di + H, dj:dj + W, :] for di in (0, 1) for dj in (0, 1)]
    patches = jnp.concatenate(taps, axis=-1)            # [N, H, W, 4*C]  (di, dj, C)
    x2d = patches.reshape(N * H * W, 4 * C)

    # phase-stacked weight: rows (di, dj, C), cols (p, q, C_out)
    # output (2i+p, 2j+q) gets w_t[:, :, p+1-2*di, q+1-2*dj] from tap (di, dj)
    w_all = jnp.zeros((2, 2, C_in, 2, 2, C_out), jnp.float32)
    for p in (0, 1):
        for q in (0, 1):
            for di in (0, 1):
                for dj in (0, 1):
                    khh = p + 1 - 2 * di
                    kww = q + 1 - 2 * dj
                    if 0 <= khh < kh and 0 <= kww < kw:
                        w_all = w_all.at[di, dj, :, p, q, :].set(w_t[:, :, khh, kww])
    w2d = w_all.reshape(4 * C_in, 4 * C_out)
    b_all = jnp.tile(b, 4)                               # bias per phase column block

    y2d = matmul_bias_relu(x2d, w2d, b_all)              # [N*H*W, 4*C_out]
    y = y2d.reshape(N, H, W, 2, 2, C_out)                # (n, i, j, p, q, co)
    y = jnp.transpose(y, (0, 1, 3, 2, 4, 5)).reshape(N, 2 * H, 2 * W, C_out)
    return y


# ---------------------------------------------------------------------------
# DSESCNet forward
# ---------------------------------------------------------------------------

def dsesc_forward(params, x_nchw):
    # NHWC internally; NCHW only at the external boundary and latent flatten.
    x = jnp.transpose(x_nchw, (0, 2, 3, 1))
    for (w, b) in params["encoder"]:
        x = conv2d_relu_nhwc(x, w, b)

    N, H, W, C = x.shape
    z = jnp.transpose(x, (0, 3, 1, 2)).reshape(N, C * H * W)   # PyTorch (C,H,W) order
    z_recon = self_expression(params["c"], z)                   # Pallas kernel
    zr_map = jnp.transpose(z_recon.reshape(N, C, H, W), (0, 2, 3, 1))

    xr = zr_map
    for (w_t, b) in params["decoder"]:
        xr = conv_transpose2d_relu_nhwc(xr, w_t, b)
    x_recon = jnp.transpose(xr, (0, 3, 1, 2))
    return x_recon, z, z_recon


def init_params(key, n_samples, filters, in_ch):
    channels = [in_ch] + list(filters)
    params = {
        "encoder": [],
        "decoder": [],
        # matches nn.Parameter(1e-10 * torch.ones(n, n))
        "c": 1e-10 * jnp.ones((n_samples, n_samples), jnp.float32),
    }
    for cin, cout in zip(channels[:-1], channels[1:]):
        key, k1, k2 = jax.random.split(key, 3)
        w = 0.1 * jax.random.normal(k1, (cout, cin, 3, 3), jnp.float32)
        b = 0.1 * jax.random.normal(k2, (cout,), jnp.float32)
        params["encoder"].append((w, b))
    rch = channels[::-1]
    for cin, cout in zip(rch[:-1], rch[1:]):
        key, k1, k2 = jax.random.split(key, 3)
        # ConvTranspose2d weight layout: [C_in, C_out, kh, kw]
        w = 0.1 * jax.random.normal(k1, (cin, cout, 3, 3), jnp.float32)
        b = 0.1 * jax.random.normal(k2, (cout,), jnp.float32)
        params["decoder"].append((w, b))
    return params


# ---------------------------------------------------------------------------
# Pure-JAX f32 reference (lax convolutions) for a numeric sanity check
# ---------------------------------------------------------------------------

def ref_forward(params, x):
    z_map = x
    for (w, b) in params["encoder"]:
        z_map = lax.conv_general_dilated(
            z_map, w, (2, 2), ((1, 1), (1, 1)),
            dimension_numbers=("NCHW", "OIHW", "NCHW"))
        z_map = jax.nn.relu(z_map + b.reshape(1, -1, 1, 1))
    shape = z_map.shape
    z = z_map.reshape(shape[0], -1)
    c = params["c"]
    c_masked = c - jnp.diag(jnp.diag(c))
    z_recon = c_masked @ z
    xr = z_recon.reshape(shape)
    for (w_t, b) in params["decoder"]:
        w_conv = jnp.transpose(w_t[:, :, ::-1, ::-1], (1, 0, 2, 3))
        xr = lax.conv_general_dilated(
            xr, w_conv, (1, 1), ((1, 2), (1, 2)), lhs_dilation=(2, 2),
            dimension_numbers=("NCHW", "OIHW", "NCHW"))
        xr = jax.nn.relu(xr + b.reshape(1, -1, 1, 1))
    return xr, z, z_recon


def _close(a, b, tol=5e-2):
    # normalized max-abs check (kernel uses bf16 MXU operands vs f32 reference)
    scale = float(jnp.max(jnp.abs(b))) + 1e-8
    return float(jnp.max(jnp.abs(a - b))) <= tol * scale


if __name__ == "__main__":
    n_samples, in_ch, H, W = 8, 3, 16, 16
    filters = [4, 8]

    key = jax.random.PRNGKey(0)
    key, kx = jax.random.split(key)
    x = jax.random.normal(kx, (n_samples, in_ch, H, W), jnp.float32)
    params = init_params(key, n_samples, filters, in_ch)

    fwd = jax.jit(dsesc_forward)
    x_recon, z, z_recon = fwd(params, x)
    jax.block_until_ready((x_recon, z, z_recon))

    # shape checks (mirror PyTorch semantics)
    assert x_recon.shape == (n_samples, in_ch, H, W)
    assert z.shape == (n_samples, filters[-1] * (H // 4) * (W // 4))
    assert z_recon.shape == z.shape

    # numeric check against the plain-JAX f32 reference
    xr_ref, z_ref, zr_ref = ref_forward(params, x)
    assert _close(z, z_ref), "encoder latent mismatch"
    assert _close(z_recon, zr_ref), "self-expression mismatch"
    assert _close(x_recon, xr_ref), "reconstruction mismatch"

    print("KERNEL_OK")
</pallas_src>

<mosaic_0001>
module attributes {stable_mosaic.version = 11 : i64} {
  func.func @_mm_bias_relu_kernel(%arg0: i32, %arg1: i32, %arg2: i32, %arg3: memref<512x128xbf16, #tpu.memory_space<vmem>>, %arg4: memref<128x128xbf16, #tpu.memory_space<vmem>>, %arg5: memref<1x128xf32, #tpu.memory_space<vmem>>, %arg6: memref<512x128xf32, #tpu.memory_space<vmem>>, %arg7: memref<512x128xf32, #tpu.memory_space<vmem>>) attributes {dimension_semantics = [#tpu.dimension_semantics<parallel>, #tpu.dimension_semantics<parallel>, #tpu.dimension_semantics<arbitrary>], iteration_bounds = array<i64: 1, 1, 1>, scalar_prefetch = 0 : i64, scratch_operands = 1 : i64, tpu.core_type = #tpu.core_type<tc>, window_params = [{transform_indices = @transform_0, window_bounds = array<i64: 512, 128>}, {transform_indices = @transform_1, window_bounds = array<i64: 128, 128>}, {transform_indices = @transform_2, window_bounds = array<i64: 1, 128>}, {transform_indices = @transform_3, window_bounds = array<i64: 512, 128>}]} {
    %c0_i32 = arith.constant 0 : i32
    %0 = arith.cmpi eq, %arg2, %c0_i32 : i32
    %1 = arith.extui %0 : i1 to i32
    %c0_i32_0 = arith.constant 0 : i32
    %2 = arith.cmpi ne, %1, %c0_i32_0 : i32
    scf.if %2 {
      %cst_10 = arith.constant 0.000000e+00 : f32
      %12 = vector.broadcast %cst_10 : f32 to vector<512x128xf32>
      %c0_11 = arith.constant 0 : index
      %c0_12 = arith.constant 0 : index
      %13 = vector.load %arg7[%c0_11, %c0_12] : memref<512x128xf32, #tpu.memory_space<vmem>>, vector<512x128xf32>
      tpu.vector_store %arg7[%c0_11, %c0_12], %12 {strides = array<i32>} : memref<512x128xf32, #tpu.memory_space<vmem>>, vector<512x128xf32>,
    } else {
    }
    %c0 = arith.constant 0 : index
    %c0_1 = arith.constant 0 : index
    %3 = vector.load %arg7[%c0, %c0_1] : memref<512x128xf32, #tpu.memory_space<vmem>>, vector<512x128xf32>
    %c0_2 = arith.constant 0 : index
    %c0_3 = arith.constant 0 : index
    %4 = vector.load %arg3[%c0_2, %c0_3] : memref<512x128xbf16, #tpu.memory_space<vmem>>, vector<512x128xbf16>
    %c0_4 = arith.constant 0 : index
    %c0_5 = arith.constant 0 : index
    %5 = vector.load %arg4[%c0_4, %c0_5] : memref<128x128xbf16, #tpu.memory_space<vmem>>, vector<128x128xbf16>
    %cst = arith.constant dense<0.000000e+00> : vector<512x128xf32>
    %6 = tpu.matmul %4, %5, %cst {dimension_numbers = #tpu.dot_dimension_numbers<[1], [0], [0], [1], [0, 0, 1, 1], [], []>} : vector<512x128xbf16>, vector<128x128xbf16>, vector<512x128xf32> -> vector<512x128xf32>
    %7 = arith.addf %3, %6 : vector<512x128xf32>
    %c0_6 = arith.constant 0 : index
    %c0_7 = arith.constant 0 : index
    %8 = vector.load %arg7[%c0_6, %c0_7] : memref<512x128xf32, #tpu.memory_space<vmem>>, vector<512x128xf32>
    tpu.vector_store %arg7[%c0_6, %c0_7], %7 {strides = array<i32>} : memref<512x128xf32, #tpu.memory_space<vmem>>, vector<512x128xf32>,
    %c0_i32_8 = arith.constant 0 : i32
    %9 = arith.cmpi eq, %arg2, %c0_i32_8 : i32
    %10 = arith.extui %9 : i1 to i32
    %c0_i32_9 = arith.constant 0 : i32
    %11 = arith.cmpi ne, %10, %c0_i32_9 : i32
    scf.if %11 {
      %c0_10 = arith.constant 0 : index
      %c0_11 = arith.constant 0 : index
      %12 = vector.load %arg7[%c0_10, %c0_11] : memref<512x128xf32, #tpu.memory_space<vmem>>, vector<512x128xf32>
      %c0_12 = arith.constant 0 : index
      %c0_13 = arith.constant 0 : index
      %13 = vector.load %arg5[%c0_12, %c0_13] : memref<1x128xf32, #tpu.memory_space<vmem>>, vector<1x128xf32>
      %14 = vector.broadcast %13 : vector<1x128xf32> to vector<512x128xf32>
      %15 = arith.addf %12, %14 : vector<512x128xf32>
      %cst_14 = arith.constant 0.000000e+00 : f32
      %16 = vector.broadcast %cst_14 : f32 to vector<512x128xf32>
      %17 = arith.maximumf %15, %16 : vector<512x128xf32>
      %c0_15 = arith.constant 0 : index
      %c0_16 = arith.constant 0 : index
      %18 = vector.load %arg6[%c0_15, %c0_16] : memref<512x128xf32, #tpu.memory_space<vmem>>, vector<512x128xf32>
      tpu.vector_store %arg6[%c0_15, %c0_16], %17 {strides = array<i32>} : memref<512x128xf32, #tpu.memory_space<vmem>>, vector<512x128xf32>,
    } else {
    }
    return
  }
  func.func @transform_0(%arg0: i32, %arg1: i32, %arg2: i32) -> (i32, i32) {
    %c0_i32 = arith.constant 0 : i32
    return %arg0, %arg2 : i32, i32
  }
  func.func @transform_1(%arg0: i32, %arg1: i32, %arg2: i32) -> (i32, i32) {
    %c0_i32 = arith.constant 0 : i32
    return %arg2, %arg1 : i32, i32
  }
  func.func @transform_2(%arg0: i32, %arg1: i32, %arg2: i32) -> (i32, i32) {
    %c0_i32 = arith.constant 0 : i32
    %c0_i32_0 = arith.constant 0 : i32
    return %c0_i32, %arg1 : i32, i32
  }
  func.func @transform_3(%arg0: i32, %arg1: i32, %arg2: i32) -> (i32, i32) {
    %c0_i32 = arith.constant 0 : i32
    return %arg0, %arg1 : i32, i32
  }
}

module attributes {stable_mosaic.version = 11 : i64} {
  func.func @_mm_bias_relu_kernel(%arg0: i32, %arg1: i32, %arg2: i32, %arg3: memref<128x128xbf16, #tpu.memory_space<vmem>>, %arg4: memref<128x128xbf16, #tpu.memory_space<vmem>>, %arg5: memref<1x128xf32, #tpu.memory_space<vmem>>, %arg6: memref<128x128xf32, #tpu.memory_space<vmem>>, %arg7: memref<128x128xf32, #tpu.memory_space<vmem>>) attributes {dimension_semantics = [#tpu.dimension_semantics<parallel>, #tpu.dimension_semantics<parallel>, #tpu.dimension_semantics<arbitrary>], iteration_bounds = array<i64: 1, 1, 1>, scalar_prefetch = 0 : i64, scratch_operands = 1 : i64, tpu.core_type = #tpu.core_type<tc>, window_params = [{transform_indices = @transform_0, window_bounds = array<i64: 128, 128>}, {transform_indices = @transform_1, window_bounds = array<i64: 128, 128>}, {transform_indices = @transform_2, window_bounds = array<i64: 1, 128>}, {transform_indices = @transform_3, window_bounds = array<i64: 128, 128>}]} {
    %c0_i32 = arith.constant 0 : i32
    %0 = arith.cmpi eq, %arg2, %c0_i32 : i32
    %1 = arith.extui %0 : i1 to i32
    %c0_i32_0 = arith.constant 0 : i32
    %2 = arith.cmpi ne, %1, %c0_i32_0 : i32
    scf.if %2 {
      %cst_10 = arith.constant 0.000000e+00 : f32
      %12 = vector.broadcast %cst_10 : f32 to vector<128x128xf32>
      %c0_11 = arith.constant 0 : index
      %c0_12 = arith.constant 0 : index
      %13 = vector.load %arg7[%c0_11, %c0_12] : memref<128x128xf32, #tpu.memory_space<vmem>>, vector<128x128xf32>
      tpu.vector_store %arg7[%c0_11, %c0_12], %12 {strides = array<i32>} : memref<128x128xf32, #tpu.memory_space<vmem>>, vector<128x128xf32>,
    } else {
    }
    %c0 = arith.constant 0 : index
    %c0_1 = arith.constant 0 : index
    %3 = vector.load %arg7[%c0, %c0_1] : memref<128x128xf32, #tpu.memory_space<vmem>>, vector<128x128xf32>
    %c0_2 = arith.constant 0 : index
    %c0_3 = arith.constant 0 : index
    %4 = vector.load %arg3[%c0_2, %c0_3] : memref<128x128xbf16, #tpu.memory_space<vmem>>, vector<128x128xbf16>
    %c0_4 = arith.constant 0 : index
    %c0_5 = arith.constant 0 : index
    %5 = vector.load %arg4[%c0_4, %c0_5] : memref<128x128xbf16, #tpu.memory_space<vmem>>, vector<128x128xbf16>
    %cst = arith.constant dense<0.000000e+00> : vector<128x128xf32>
    %6 = tpu.matmul %4, %5, %cst {dimension_numbers = #tpu.dot_dimension_numbers<[1], [0], [0], [1], [0, 0, 1, 1], [], []>} : vector<128x128xbf16>, vector<128x128xbf16>, vector<128x128xf32> -> vector<128x128xf32>
    %7 = arith.addf %3, %6 : vector<128x128xf32>
    %c0_6 = arith.constant 0 : index
    %c0_7 = arith.constant 0 : index
    %8 = vector.load %arg7[%c0_6, %c0_7] : memref<128x128xf32, #tpu.memory_space<vmem>>, vector<128x128xf32>
    tpu.vector_store %arg7[%c0_6, %c0_7], %7 {strides = array<i32>} : memref<128x128xf32, #tpu.memory_space<vmem>>, vector<128x128xf32>,
    %c0_i32_8 = arith.constant 0 : i32
    %9 = arith.cmpi eq, %arg2, %c0_i32_8 : i32
    %10 = arith.extui %9 : i1 to i32
    %c0_i32_9 = arith.constant 0 : i32
    %11 = arith.cmpi ne, %10, %c0_i32_9 : i32
    scf.if %11 {
      %c0_10 = arith.constant 0 : index
      %c0_11 = arith.constant 0 : index
      %12 = vector.load %arg7[%c0_10, %c0_11] : memref<128x128xf32, #tpu.memory_space<vmem>>, vector<128x128xf32>
      %c0_12 = arith.constant 0 : index
      %c0_13 = arith.constant 0 : index
      %13 = vector.load %arg5[%c0_12, %c0_13] : memref<1x128xf32, #tpu.memory_space<vmem>>, vector<1x128xf32>
      %14 = vector.broadcast %13 : vector<1x128xf32> to vector<128x128xf32>
      %15 = arith.addf %12, %14 : vector<128x128xf32>
      %cst_14 = arith.constant 0.000000e+00 : f32
      %16 = vector.broadcast %cst_14 : f32 to vector<128x128xf32>
      %17 = arith.maximumf %15, %16 : vector<128x128xf32>
      %c0_15 = arith.constant 0 : index
      %c0_16 = arith.constant 0 : index
      %18 = vector.load %arg6[%c0_15, %c0_16] : memref<128x128xf32, #tpu.memory_space<vmem>>, vector<128x128xf32>
      tpu.vector_store %arg6[%c0_15, %c0_16], %17 {strides = array<i32>} : memref<128x128xf32, #tpu.memory_space<vmem>>, vector<128x128xf32>,
    } else {
    }
    return
  }
  func.func @transform_0(%arg0: i32, %arg1: i32, %arg2: i32) -> (i32, i32) {
    %c0_i32 = arith.constant 0 : i32
    return %arg0, %arg2 : i32, i32
  }
  func.func @transform_1(%arg0: i32, %arg1: i32, %arg2: i32) -> (i32, i32) {
    %c0_i32 = arith.constant 0 : i32
    return %arg2, %arg1 : i32, i32
  }
  func.func @transform_2(%arg0: i32, %arg1: i32, %arg2: i32) -> (i32, i32) {
    %c0_i32 = arith.constant 0 : i32
    %c0_i32_0 = arith.constant 0 : i32
    return %c0_i32, %arg1 : i32, i32
  }
  func.func @transform_3(%arg0: i32, %arg1: i32, %arg2: i32) -> (i32, i32) {
    %c0_i32 = arith.constant 0 : i32
    return %arg0, %arg1 : i32, i32
  }
}

module attributes {stable_mosaic.version = 11 : i64} {
  func.func @_self_expr_kernel(%arg0: i32, %arg1: i32, %arg2: i32, %arg3: memref<128x128xbf16, #tpu.memory_space<vmem>>, %arg4: memref<128x128xbf16, #tpu.memory_space<vmem>>, %arg5: memref<128x128xf32, #tpu.memory_space<vmem>>, %arg6: memref<128x128xf32, #tpu.memory_space<vmem>>) attributes {dimension_semantics = [#tpu.dimension_semantics<parallel>, #tpu.dimension_semantics<parallel>, #tpu.dimension_semantics<arbitrary>], iteration_bounds = array<i64: 1, 1, 1>, scalar_prefetch = 0 : i64, scratch_operands = 1 : i64, tpu.core_type = #tpu.core_type<tc>, window_params = [{transform_indices = @transform_0, window_bounds = array<i64: 128, 128>}, {transform_indices = @transform_1, window_bounds = array<i64: 128, 128>}, {transform_indices = @transform_2, window_bounds = array<i64: 128, 128>}]} {
    %c0_i32 = arith.constant 0 : i32
    %0 = arith.cmpi eq, %arg2, %c0_i32 : i32
    %1 = arith.extui %0 : i1 to i32
    %c0_i32_0 = arith.constant 0 : i32
    %2 = arith.cmpi ne, %1, %c0_i32_0 : i32
    scf.if %2 {
      %cst_11 = arith.constant 0.000000e+00 : f32
      %20 = vector.broadcast %cst_11 : f32 to vector<128x128xf32>
      %c0_12 = arith.constant 0 : index
      %c0_13 = arith.constant 0 : index
      %21 = vector.load %arg6[%c0_12, %c0_13] : memref<128x128xf32, #tpu.memory_space<vmem>>, vector<128x128xf32>
      tpu.vector_store %arg6[%c0_12, %c0_13], %20 {strides = array<i32>} : memref<128x128xf32, #tpu.memory_space<vmem>>, vector<128x128xf32>,
    } else {
    }
    %c0 = arith.constant 0 : index
    %c0_1 = arith.constant 0 : index
    %3 = vector.load %arg3[%c0, %c0_1] : memref<128x128xbf16, #tpu.memory_space<vmem>>, vector<128x128xbf16>
    %4 = tpu.iota {dimensions = array<i32: 0>} : vector<128x128xi32>
    %5 = tpu.iota {dimensions = array<i32: 1>} : vector<128x128xi32>
    %6 = arith.cmpi eq, %arg0, %arg2 : i32
    %7 = arith.cmpi eq, %4, %5 : vector<128x128xi32>
    %8 = vector.broadcast %6 : i1 to vector<128x128xi1>
    %9 = arith.andi %8, %7 : vector<128x128xi1>
    %cst = arith.constant 0.000000e+00 : bf16
    %10 = vector.broadcast %cst : bf16 to vector<128x128xbf16>
    %11 = arith.select %9, %10, %3 : vector<128x128xi1>, vector<128x128xbf16>
    %c0_2 = arith.constant 0 : index
    %c0_3 = arith.constant 0 : index
    %12 = vector.load %arg6[%c0_2, %c0_3] : memref<128x128xf32, #tpu.memory_space<vmem>>, vector<128x128xf32>
    %c0_4 = arith.constant 0 : index
    %c0_5 = arith.constant 0 : index
    %13 = vector.load %arg4[%c0_4, %c0_5] : memref<128x128xbf16, #tpu.memory_space<vmem>>, vector<128x128xbf16>
    %cst_6 = arith.constant dense<0.000000e+00> : vector<128x128xf32>
    %14 = tpu.matmul %11, %13, %cst_6 {dimension_numbers = #tpu.dot_dimension_numbers<[1], [0], [0], [1], [0, 0, 1, 1], [], []>} : vector<128x128xbf16>, vector<128x128xbf16>, vector<128x128xf32> -> vector<128x128xf32>
    %15 = arith.addf %12, %14 : vector<128x128xf32>
    %c0_7 = arith.constant 0 : index
    %c0_8 = arith.constant 0 : index
    %16 = vector.load %arg6[%c0_7, %c0_8] : memref<128x128xf32, #tpu.memory_space<vmem>>, vector<128x128xf32>
    tpu.vector_store %arg6[%c0_7, %c0_8], %15 {strides = array<i32>} : memref<128x128xf32, #tpu.memory_space<vmem>>, vector<128x128xf32>,
    %c0_i32_9 = arith.constant 0 : i32
    %17 = arith.cmpi eq, %arg2, %c0_i32_9 : i32
    %18 = arith.extui %17 : i1 to i32
    %c0_i32_10 = arith.constant 0 : i32
    %19 = arith.cmpi ne, %18, %c0_i32_10 : i32
    scf.if %19 {
      %c0_11 = arith.constant 0 : index
      %c0_12 = arith.constant 0 : index
      %20 = vector.load %arg6[%c0_11, %c0_12] : memref<128x128xf32, #tpu.memory_space<vmem>>, vector<128x128xf32>
      %c0_13 = arith.constant 0 : index
      %c0_14 = arith.constant 0 : index
      %21 = vector.load %arg5[%c0_13, %c0_14] : memref<128x128xf32, #tpu.memory_space<vmem>>, vector<128x128xf32>
      tpu.vector_store %arg5[%c0_13, %c0_14], %20 {strides = array<i32>} : memref<128x128xf32, #tpu.memory_space<vmem>>, vector<128x128xf32>,
    } else {
    }
    return
  }
  func.func @transform_0(%arg0: i32, %arg1: i32, %arg2: i32) -> (i32, i32) {
    %c0_i32 = arith.constant 0 : i32
    return %arg0, %arg2 : i32, i32
  }
  func.func @transform_1(%arg0: i32, %arg1: i32, %arg2: i32) -> (i32, i32) {
    %c0_i32 = arith.constant 0 : i32
    return %arg2, %arg1 : i32, i32
  }
  func.func @transform_2(%arg0: i32, %arg1: i32, %arg2: i32) -> (i32, i32) {
    %c0_i32 = arith.constant 0 : i32
    return %arg0, %arg1 : i32, i32
  }
}

</mosaic_0001>

<bundles_post_ra>
// kernel: dsesc_forward.5
= control target key start
LH: loop header
LB: loop body
LE: loop exit
PB: predicated region body
PF: predicated region fallthrough
CT: control target
= control target key end

     0   :  { %s1772_s1 = inlined_call_operand.vmem [shape: bf16[128,128], index: 1, kind: input, shape index: {}]   ;;  %s1773_s0 = inlined_call_operand.vmem [shape: bf16[512,128], index: 0, kind: input, shape index: {}]   ;;  %s1774_s2 = inlined_call_operand.vmem [shape: f32[1,128], index: 2, kind: input, shape index: {}]   ;;  %s1775_s3 = inlined_call_operand.vmem [shape: f32[512,128], index: 3, kind: output, shape index: {}]  }
   0x1   :  { %v1331_v0 = vld [vmem:[%s1772_s1] sm:$0xff]   ;;  %v1332_v1 = vld [vmem:[%s1772_s1 + $0x8] sm:$0xff]   ;;  %v1333_v2 = vld [vmem:[%s1772_s1 + $0x10] sm:$0xff]  }
   0x2   :  { %1235 = vmatprep.subr.bf16.mxu0 %v1331_v0  ;;  %1315 = vmatprep.subr.bf16.mxu1 %v1331_v0  ;;  %v1334_v3 = vld [vmem:[%s1772_s1 + $0x18] sm:$0xff]   ;;  %v1339_v4 = vld [vmem:[%s1773_s0] sm:$0xff]   ;;  %v1336_v7 = vld [vmem:[%s1772_s1 + $0x28] sm:$0xff]  }
   0x3   :  { %1236 = vmatpush3.bf16.msra.mxu0 %v1331_v0  ;;  %1323 = vmatpush3.bf16.msra.mxu1 %v1331_v0  ;;  %v1340_v5 = vld [vmem:[%s1773_s0 + $0x80] sm:$0xff]   ;;  %v1337_v8 = vld [vmem:[%s1772_s1 + $0x30] sm:$0xff]   ;;  %v1338_v9 = vld [vmem:[%s1772_s1 + $0x38] sm:$0xff]  }
   0x4   :  { %1237 = vmatprep.subr.bf16.mxu0 %v1332_v1  ;;  %1316 = vmatprep.subr.bf16.mxu1 %v1332_v1  ;;  %v1335_v6 = vld [vmem:[%s1772_s1 + $0x20] sm:$0xff]   ;;  %v1341_v10 = vld [vmem:[%s1773_s0 + $0x8] sm:$0xff]   ;;  %v1343_v12 = vld [vmem:[%s1773_s0 + $0x10] sm:$0xff]  }
   0x5   :  { %1251 = vmatprep.mubr.bf16.mxu0 %v1339_v4  ;;  %1283 = vmatprep.mubr.bf16.mxu1 %v1340_v5  ;;  %v1342_v11 = vld [vmem:[%s1773_s0 + $0x88] sm:$0xff]   ;;  %v1344_v13 = vld [vmem:[%s1773_s0 + $0x90] sm:$0xff]   ;;  %v1345_v14 = vld [vmem:[%s1773_s0 + $0x18] sm:$0xff]  }
   0x6   :  { %v1346_v15 = vld [vmem:[%s1773_s0 + $0x98] sm:$0xff]   ;;  %v1347_v16 = vld [vmem:[%s1773_s0 + $0x20] sm:$0xff]   ;;  %v1349_v18 = vld [vmem:[%s1773_s0 + $0x28] sm:$0xff]  }
   0x7   :  { %1238 = vmatpush3.bf16.msra.mxu0 %v1332_v1  ;;  %1324 = vmatpush3.bf16.msra.mxu1 %v1332_v1  ;;  %v1348_v17 = vld [vmem:[%s1773_s0 + $0xa0] sm:$0xff]   ;;  %v1350_v19 = vld [vmem:[%s1773_s0 + $0xa8] sm:$0xff]   ;;  %v1351_v20 = vld [vmem:[%s1773_s0 + $0x30] sm:$0xff]  }
   0x8   :  { %1239 = vmatprep.subr.bf16.mxu0 %v1333_v2  ;;  %1317 = vmatprep.subr.bf16.mxu1 %v1333_v2  ;;  %v1352_v21 = vld [vmem:[%s1773_s0 + $0xb0] sm:$0xff]   ;;  %v1353_v22 = vld [vmem:[%s1773_s0 + $0x38] sm:$0xff]   ;;  %v1355_v24 = vld [vmem:[%s1773_s0 + $0x40] sm:$0xff]  }
   0x9   :  { %v1354_v23 = vld [vmem:[%s1773_s0 + $0xb8] sm:$0xff]   ;;  %v1356_v25 = vld [vmem:[%s1773_s0 + $0xc0] sm:$0xff]   ;;  %v1357_v26 = vld [vmem:[%s1773_s0 + $0x48] sm:$0xff]  }
   0xa   :  { %v1358_v27 = vld [vmem:[%s1773_s0 + $0xc8] sm:$0xff]   ;;  %v1359_v28 = vld [vmem:[%s1773_s0 + $0x50] sm:$0xff]   ;;  %v1361_v30 = vld [vmem:[%s1773_s0 + $0x58] sm:$0xff]  }
   0xb   :  { %1240 = vmatpush3.bf16.msra.mxu0 %v1333_v2  ;;  %1325 = vmatpush3.bf16.msra.mxu1 %v1333_v2  ;;  %v1360_v29 = vld [vmem:[%s1773_s0 + $0xd0] sm:$0xff]   ;;  %v1362_v31 = vld [vmem:[%s1773_s0 + $0xd8] sm:$0xff]   ;;  %v1363_v32 = vld [vmem:[%s1773_s0 + $0x60] sm:$0xff]  }
   0xc   :  { %1241 = vmatprep.subr.bf16.mxu0 %v1334_v3  ;;  %1318 = vmatprep.subr.bf16.mxu1 %v1334_v3  ;;  %v1364_v33 = vld [vmem:[%s1773_s0 + $0xe0] sm:$0xff]   ;;  %v1365_v34 = vld [vmem:[%s1773_s0 + $0x68] sm:$0xff]   ;;  %v1367_v36 = vld [vmem:[%s1773_s0 + $0x70] sm:$0xff]  }
   0xd   :  { %v1366_v35 = vld [vmem:[%s1773_s0 + $0xe8] sm:$0xff]   ;;  %v1368_v37 = vld [vmem:[%s1773_s0 + $0xf0] sm:$0xff]   ;;  %v1369_v38 = vld [vmem:[%s1773_s0 + $0x78] sm:$0xff]  }
   0xe   :  { %v1370_v39 = vld [vmem:[%s1773_s0 + $0xf8] sm:$0xff]   ;;  %v1514_v40 = vld [vmem:[%s1774_s2] ss:$0 sm:$0xff] }
   0xf   :  { %1242 = vmatpush3.bf16.msra.mxu0 %v1334_v3  ;;  %1326 = vmatpush3.bf16.msra.mxu1 %v1334_v3 }
  0x10   :  { %1243 = vmatprep.subr.bf16.mxu0 %v1335_v6  ;;  %1319 = vmatprep.subr.bf16.mxu1 %v1335_v6 }
  0x13   :  { %1244 = vmatpush3.bf16.msra.mxu0 %v1335_v6  ;;  %1327 = vmatpush3.bf16.msra.mxu1 %v1335_v6 }
  0x14   :  { %1245 = vmatprep.subr.bf16.mxu0 %v1336_v7  ;;  %1320 = vmatprep.subr.bf16.mxu1 %v1336_v7 }
  0x17   :  { %1246 = vmatpush3.bf16.msra.mxu0 %v1336_v7  ;;  %1328 = vmatpush3.bf16.msra.mxu1 %v1336_v7 }
  0x18   :  { %1247 = vmatprep.subr.bf16.mxu0 %v1337_v8  ;;  %1321 = vmatprep.subr.bf16.mxu1 %v1337_v8 }
  0x1b   :  { %1248 = vmatpush3.bf16.msra.mxu0 %v1337_v8  ;;  %1329 = vmatpush3.bf16.msra.mxu1 %v1337_v8 }
  0x1c   :  { %1249 = vmatprep.subr.bf16.mxu0 %v1338_v9  ;;  %1322 = vmatprep.subr.bf16.mxu1 %v1338_v9 }
  0x1f   :  { %1250 = vmatpush3.bf16.msra.mxu0 %v1338_v9  ;;  %1330 = vmatpush3.bf16.msra.mxu1 %v1338_v9 }
  0x22   :  { %1252 = vmatmul.mubr.bf16.vlgmr.msra.gmra.mrb[0].mxu0 %v1341_v10  ;;  %1284 = vmatmul.mubr.bf16.vlgmr.msra.gmra.mrb[0].mxu1 %v1342_v11 }
  0x23   :  { %1255 = vmatprep.mubr.bf16.mxu0 %v1343_v12  ;;  %1287 = vmatprep.mubr.bf16.mxu1 %v1344_v13 }
  0x2a   :  { %1256 = vmatmul.mubr.bf16.gmra.mrb[4].mxu0 %v1345_v14  ;;  %1288 = vmatmul.mubr.bf16.gmra.mrb[4].mxu1 %v1346_v15 }
  0x2b   :  { %1259 = vmatprep.mubr.bf16.mxu0 %v1347_v16  ;;  %1291 = vmatprep.mubr.bf16.mxu1 %v1348_v17 }
  0x32   :  { %1260 = vmatmul.mubr.bf16.gmra.mrb[8].mxu0 %v1349_v18  ;;  %1292 = vmatmul.mubr.bf16.gmra.mrb[8].mxu1 %v1350_v19 }
  0x33   :  { %1263 = vmatprep.mubr.bf16.mxu0 %v1351_v20  ;;  %1295 = vmatprep.mubr.bf16.mxu1 %v1352_v21 }
  0x3a   :  { %1264 = vmatmul.mubr.bf16.gmra.mrb[12].mxu0 %v1353_v22  ;;  %1296 = vmatmul.mubr.bf16.gmra.mrb[12].mxu1 %v1354_v23 }
  0x3b   :  { %1267 = vmatprep.mubr.bf16.mxu0 %v1355_v24  ;;  %1299 = vmatprep.mubr.bf16.mxu1 %v1356_v25 }
  0x42   :  { %1268 = vmatmul.mubr.bf16.gmra.mrb[16].mxu0 %v1357_v26  ;;  %1300 = vmatmul.mubr.bf16.gmra.mrb[16].mxu1 %v1358_v27 }
  0x43   :  { %1271 = vmatprep.mubr.bf16.mxu0 %v1359_v28  ;;  %1303 = vmatprep.mubr.bf16.mxu1 %v1360_v29 }
  0x4a   :  { %1272 = vmatmul.mubr.bf16.gmra.mrb[20].mxu0 %v1361_v30  ;;  %1304 = vmatmul.mubr.bf16.gmra.mrb[20].mxu1 %v1362_v31 }
  0x4b   :  { %1275 = vmatprep.mubr.bf16.mxu0 %v1363_v32  ;;  %1307 = vmatprep.mubr.bf16.mxu1 %v1364_v33 }
  0x52   :  { %1276 = vmatmul.mubr.bf16.gmra.mrb[24].mxu0 %v1365_v34  ;;  %1308 = vmatmul.mubr.bf16.gmra.mrb[24].mxu1 %v1366_v35 }
  0x53   :  { %1279 = vmatprep.mubr.bf16.mxu0 %v1367_v36  ;;  %1311 = vmatprep.mubr.bf16.mxu1 %v1368_v37 }
  0x5a   :  { %1280 = vmatmul.mubr.bf16.gmra.mrb[28].mxu0 %v1369_v38  ;;  %1312 = vmatmul.mubr.bf16.gmra.mrb[28].mxu1 %v1370_v39 }
  0xf5   :  { %v1253_v41 = vpop.f32.mrb[0].mxu0  ;;  %v1285_v42 = vpop.f32.mrb[0].mxu1 }
  0xf6   :  { %v960_v43 = vadd.f32 %v1253_v41, %v1514_v40  ;;  %v992_v44 = vadd.f32 %v1285_v42, %v1514_v40  ;;  %v501_v45 = vpop.f32.mrb[1].mxu0  ;;  %v629_v46 = vpop.f32.mrb[1].mxu1 }
  0xf7   :  { %v958_v47 = vadd.f32 %v1514_v40, %v501_v45  ;;  %v990_v48 = vadd.f32 %v1514_v40, %v629_v46  ;;  %v1254_v49 = vpop.f32.mrb[2].mxu0  ;;  %v1286_v50 = vpop.f32.mrb[2].mxu1 }
  0xf8   :  { %v1024_v51 = vmax.f32 %v960_v43, 0.0  ;;  %v1056_v52 = vmax.f32 %v992_v44, 0.0  ;;  %v961_v53 = vadd.f32 %v1254_v49, %v1514_v40  ;;  %v993_v54 = vadd.f32 %v1286_v50, %v1514_v40  ;;  %v504_v55 = vpop.f32.mrb[3].mxu0  ;;  %v632_v56 = vpop.f32.mrb[3].mxu1 }
  0xf9   :  { %v1022_v57 = vmax.f32 %v958_v47, 0.0  ;;  %v1054_v58 = vmax.f32 %v990_v48, 0.0  ;;  %v959_v59 = vadd.f32 %v1514_v40, %v504_v55  ;;  %v991_v60 = vadd.f32 %v1514_v40, %v632_v56 }
  0xfa   :  { %1088 = vst [vmem:[%s1775_s3 + $0x10] sm:$0xff] %v1024_v51  ;;  %1120 = vst [vmem:[%s1775_s3 + $0x110] sm:$0xff] %v1056_v52  ;;  %v1025_v61 = vmax.f32 %v961_v53, 0.0  ;;  %v1057_v62 = vmax.f32 %v993_v54, 0.0 }
  0xfb   :  { %1086 = vst [vmem:[%s1775_s3] sm:$0xff] %v1022_v57  ;;  %1118 = vst [vmem:[%s1775_s3 + $0x100] sm:$0xff] %v1054_v58  ;;  %v1023_v63 = vmax.f32 %v959_v59, 0.0  ;;  %v1055_v0 = vmax.f32 %v991_v60, 0.0 }
  0xfc   :  { %1089 = vst [vmem:[%s1775_s3 + $0x18] sm:$0xff] %v1025_v61  ;;  %1121 = vst [vmem:[%s1775_s3 + $0x118] sm:$0xff] %v1057_v62 }
  0xfd   :  { %1087 = vst [vmem:[%s1775_s3 + $0x8] sm:$0xff] %v1023_v63  ;;  %1119 = vst [vmem:[%s1775_s3 + $0x108] sm:$0xff] %v1055_v0  ;;  %v1257_v1 = vpop.f32.mrb[4].mxu0  ;;  %v1289_v2 = vpop.f32.mrb[4].mxu1 }
  0xfe   :  { %v964_v3 = vadd.f32 %v1257_v1, %v1514_v40  ;;  %v996_v4 = vadd.f32 %v1289_v2, %v1514_v40  ;;  %v517_v5 = vpop.f32.mrb[5].mxu0  ;;  %v645_v6 = vpop.f32.mrb[5].mxu1 }
  0xff   :  { %v962_v7 = vadd.f32 %v1514_v40, %v517_v5  ;;  %v994_v8 = vadd.f32 %v1514_v40, %v645_v6  ;;  %v1258_v9 = vpop.f32.mrb[6].mxu0  ;;  %v1290_v10 = vpop.f32.mrb[6].mxu1 }
 0x100   :  { %v1028_v11 = vmax.f32 %v964_v3, 0.0  ;;  %v1060_v12 = vmax.f32 %v996_v4, 0.0  ;;  %v965_v13 = vadd.f32 %v1258_v9, %v1514_v40  ;;  %v997_v14 = vadd.f32 %v1290_v10, %v1514_v40  ;;  %v520_v15 = vpop.f32.mrb[7].mxu0  ;;  %v648_v16 = vpop.f32.mrb[7].mxu1 }
 0x101   :  { %v1026_v17 = vmax.f32 %v962_v7, 0.0  ;;  %v1058_v18 = vmax.f32 %v994_v8, 0.0  ;;  %v963_v19 = vadd.f32 %v1514_v40, %v520_v15  ;;  %v995_v20 = vadd.f32 %v1514_v40, %v648_v16 }
 0x102   :  { %1092 = vst [vmem:[%s1775_s3 + $0x30] sm:$0xff] %v1028_v11  ;;  %1124 = vst [vmem:[%s1775_s3 + $0x130] sm:$0xff] %v1060_v12  ;;  %v1029_v21 = vmax.f32 %v965_v13, 0.0  ;;  %v1061_v22 = vmax.f32 %v997_v14, 0.0 }
 0x103   :  { %1090 = vst [vmem:[%s1775_s3 + $0x20] sm:$0xff] %v1026_v17  ;;  %1122 = vst [vmem:[%s1775_s3 + $0x120] sm:$0xff] %v1058_v18  ;;  %v1027_v23 = vmax.f32 %v963_v19, 0.0  ;;  %v1059_v24 = vmax.f32 %v995_v20, 0.0 }
 0x104   :  { %1093 = vst [vmem:[%s1775_s3 + $0x38] sm:$0xff] %v1029_v21  ;;  %1125 = vst [vmem:[%s1775_s3 + $0x138] sm:$0xff] %v1061_v22 }
 0x105   :  { %1091 = vst [vmem:[%s1775_s3 + $0x28] sm:$0xff] %v1027_v23  ;;  %1123 = vst [vmem:[%s1775_s3 + $0x128] sm:$0xff] %v1059_v24  ;;  %v1261_v25 = vpop.f32.mrb[8].mxu0  ;;  %v1293_v26 = vpop.f32.mrb[8].mxu1 }
 0x106   :  { %v968_v27 = vadd.f32 %v1261_v25, %v1514_v40  ;;  %v1000_v28 = vadd.f32 %v1293_v26, %v1514_v40  ;;  %v533_v29 = vpop.f32.mrb[9].mxu0  ;;  %v661_v30 = vpop.f32.mrb[9].mxu1 }
 0x107   :  { %v966_v31 = vadd.f32 %v1514_v40, %v533_v29  ;;  %v998_v32 = vadd.f32 %v1514_v40, %v661_v30  ;;  %v1262_v33 = vpop.f32.mrb[10].mxu0  ;;  %v1294_v34 = vpop.f32.mrb[10].mxu1 }
 0x108   :  { %v1032_v35 = vmax.f32 %v968_v27, 0.0  ;;  %v1064_v36 = vmax.f32 %v1000_v28, 0.0  ;;  %v969_v37 = vadd.f32 %v1262_v33, %v1514_v40  ;;  %v1001_v38 = vadd.f32 %v1294_v34, %v1514_v40  ;;  %v536_v39 = vpop.f32.mrb[11].mxu0  ;;  %v664_v41 = vpop.f32.mrb[11].mxu1 }
 0x109   :  { %v1030_v42 = vmax.f32 %v966_v31, 0.0  ;;  %v1062_v43 = vmax.f32 %v998_v32, 0.0  ;;  %v967_v44 = vadd.f32 %v1514_v40, %v536_v39  ;;  %v999_v45 = vadd.f32 %v1514_v40, %v664_v41 }
 0x10a   :  { %1096 = vst [vmem:[%s1775_s3 + $0x50] sm:$0xff] %v1032_v35  ;;  %1128 = vst [vmem:[%s1775_s3 + $0x150] sm:$0xff] %v1064_v36  ;;  %v1033_v46 = vmax.f32 %v969_v37, 0.0  ;;  %v1065_v47 = vmax.f32 %v1001_v38, 0.0 }
 0x10b   :  { %1094 = vst [vmem:[%s1775_s3 + $0x40] sm:$0xff] %v1030_v42  ;;  %1126 = vst [vmem:[%s1775_s3 + $0x140] sm:$0xff] %v1062_v43  ;;  %v1031_v48 = vmax.f32 %v967_v44, 0.0  ;;  %v1063_v49 = vmax.f32 %v999_v45, 0.0 }
 0x10c   :  { %1097 = vst [vmem:[%s1775_s3 + $0x58] sm:$0xff] %v1033_v46  ;;  %1129 = vst [vmem:[%s1775_s3 + $0x158] sm:$0xff] %v1065_v47 }
 0x10d   :  { %1095 = vst [vmem:[%s1775_s3 + $0x48] sm:$0xff] %v1031_v48  ;;  %1127 = vst [vmem:[%s1775_s3 + $0x148] sm:$0xff] %v1063_v49  ;;  %v1265_v50 = vpop.f32.mrb[12].mxu0  ;;  %v1297_v51 = vpop.f32.mrb[12].mxu1 }
 0x10e   :  { %v972_v52 = vadd.f32 %v1265_v50, %v1514_v40  ;;  %v1004_v53 = vadd.f32 %v1297_v51, %v1514_v40  ;;  %v549_v54 = vpop.f32.mrb[13].mxu0  ;;  %v677_v55 = vpop.f32.mrb[13].mxu1 }
 0x10f   :  { %v970_v56 = vadd.f32 %v1514_v40, %v549_v54  ;;  %v1002_v57 = vadd.f32 %v1514_v40, %v677_v55  ;;  %v1266_v58 = vpop.f32.mrb[14].mxu0  ;;  %v1298_v59 = vpop.f32.mrb[14].mxu1 }
 0x110   :  { %v1036_v60 = vmax.f32 %v972_v52, 0.0  ;;  %v1068_v61 = vmax.f32 %v1004_v53, 0.0  ;;  %v973_v62 = vadd.f32 %v1266_v58, %v1514_v40  ;;  %v1005_v63 = vadd.f32 %v1298_v59, %v1514_v40  ;;  %v552_v0 = vpop.f32.mrb[15].mxu0  ;;  %v680_v1 = vpop.f32.mrb[15].mxu1 }
 0x111   :  { %v1034_v2 = vmax.f32 %v970_v56, 0.0  ;;  %v1066_v3 = vmax.f32 %v1002_v57, 0.0  ;;  %v971_v4 = vadd.f32 %v1514_v40, %v552_v0  ;;  %v1003_v5 = vadd.f32 %v1514_v40, %v680_v1 }
 0x112   :  { %1100 = vst [vmem:[%s1775_s3 + $0x70] sm:$0xff] %v1036_v60  ;;  %1132 = vst [vmem:[%s1775_s3 + $0x170] sm:$0xff] %v1068_v61  ;;  %v1037_v6 = vmax.f32 %v973_v62, 0.0  ;;  %v1069_v7 = vmax.f32 %v1005_v63, 0.0 }
 0x113   :  { %1098 = vst [vmem:[%s1775_s3 + $0x60] sm:$0xff] %v1034_v2  ;;  %1130 = vst [vmem:[%s1775_s3 + $0x160] sm:$0xff] %v1066_v3  ;;  %v1035_v8 = vmax.f32 %v971_v4, 0.0  ;;  %v1067_v9 = vmax.f32 %v1003_v5, 0.0 }
 0x114   :  { %1101 = vst [vmem:[%s1775_s3 + $0x78] sm:$0xff] %v1037_v6  ;;  %1133 = vst [vmem:[%s1775_s3 + $0x178] sm:$0xff] %v1069_v7 }
 0x115   :  { %1099 = vst [vmem:[%s1775_s3 + $0x68] sm:$0xff] %v1035_v8  ;;  %1131 = vst [vmem:[%s1775_s3 + $0x168] sm:$0xff] %v1067_v9  ;;  %v1269_v10 = vpop.f32.mrb[16].mxu0  ;;  %v1301_v11 = vpop.f32.mrb[16].mxu1 }
 0x116   :  { %v976_v12 = vadd.f32 %v1269_v10, %v1514_v40  ;;  %v1008_v13 = vadd.f32 %v1301_v11, %v1514_v40  ;;  %v565_v14 = vpop.f32.mrb[17].mxu0  ;;  %v693_v15 = vpop.f32.mrb[17].mxu1 }
 0x117   :  { %v974_v16 = vadd.f32 %v1514_v40, %v565_v14  ;;  %v1006_v17 = vadd.f32 %v1514_v40, %v693_v15  ;;  %v1270_v18 = vpop.f32.mrb[18].mxu0  ;;  %v1302_v19 = vpop.f32.mrb[18].mxu1 }
 0x118   :  { %v1040_v20 = vmax.f32 %v976_v12, 0.0  ;;  %v1072_v21 = vmax.f32 %v1008_v13, 0.0  ;;  %v977_v22 = vadd.f32 %v1270_v18, %v1514_v40  ;;  %v1009_v23 = vadd.f32 %v1302_v19, %v1514_v40  ;;  %v568_v24 = vpop.f32.mrb[19].mxu0  ;;  %v696_v25 = vpop.f32.mrb[19].mxu1 }
 0x119   :  { %v1038_v26 = vmax.f32 %v974_v16, 0.0  ;;  %v1070_v27 = vmax.f32 %v1006_v17, 0.0  ;;  %v975_v28 = vadd.f32 %v1514_v40, %v568_v24  ;;  %v1007_v29 = vadd.f32 %v1514_v40, %v696_v25 }
 0x11a   :  { %1104 = vst [vmem:[%s1775_s3 + $0x90] sm:$0xff] %v1040_v20  ;;  %1136 = vst [vmem:[%s1775_s3 + $0x190] sm:$0xff] %v1072_v21  ;;  %v1041_v30 = vmax.f32 %v977_v22, 0.0  ;;  %v1073_v31 = vmax.f32 %v1009_v23, 0.0 }
 0x11b   :  { %1102 = vst [vmem:[%s1775_s3 + $0x80] sm:$0xff] %v1038_v26  ;;  %1134 = vst [vmem:[%s1775_s3 + $0x180] sm:$0xff] %v1070_v27  ;;  %v1039_v32 = vmax.f32 %v975_v28, 0.0  ;;  %v1071_v33 = vmax.f32 %v1007_v29, 0.0 }
 0x11c   :  { %1105 = vst [vmem:[%s1775_s3 + $0x98] sm:$0xff] %v1041_v30  ;;  %1137 = vst [vmem:[%s1775_s3 + $0x198] sm:$0xff] %v1073_v31 }
 0x11d   :  { %1103 = vst [vmem:[%s1775_s3 + $0x88] sm:$0xff] %v1039_v32  ;;  %1135 = vst [vmem:[%s1775_s3 + $0x188] sm:$0xff] %v1071_v33  ;;  %v1273_v34 = vpop.f32.mrb[20].mxu0  ;;  %v1305_v35 = vpop.f32.mrb[20].mxu1 }
 0x11e   :  { %v980_v36 = vadd.f32 %v1273_v34, %v1514_v40  ;;  %v1012_v37 = vadd.f32 %v1305_v35, %v1514_v40  ;;  %v581_v38 = vpop.f32.mrb[21].mxu0  ;;  %v709_v39 = vpop.f32.mrb[21].mxu1 }
 0x11f   :  { %v978_v41 = vadd.f32 %v1514_v40, %v581_v38  ;;  %v1010_v42 = vadd.f32 %v1514_v40, %v709_v39  ;;  %v1274_v43 = vpop.f32.mrb[22].mxu0  ;;  %v1306_v44 = vpop.f32.mrb[22].mxu1 }
 0x120   :  { %v1044_v45 = vmax.f32 %v980_v36, 0.0  ;;  %v1076_v46 = vmax.f32 %v1012_v37, 0.0  ;;  %v981_v47 = vadd.f32 %v1274_v43, %v1514_v40  ;;  %v1013_v48 = vadd.f32 %v1306_v44, %v1514_v40  ;;  %v584_v49 = vpop.f32.mrb[23].mxu0  ;;  %v712_v50 = vpop.f32.mrb[23].mxu1 }
 0x121   :  { %v1042_v51 = vmax.f32 %v978_v41, 0.0  ;;  %v1074_v52 = vmax.f32 %v1010_v42, 0.0  ;;  %v979_v53 = vadd.f32 %v1514_v40, %v584_v49  ;;  %v1011_v54 = vadd.f32 %v1514_v40, %v712_v50 }
 0x122   :  { %1108 = vst [vmem:[%s1775_s3 + $0xb0] sm:$0xff] %v1044_v45  ;;  %1140 = vst [vmem:[%s1775_s3 + $0x1b0] sm:$0xff] %v1076_v46  ;;  %v1045_v55 = vmax.f32 %v981_v47, 0.0  ;;  %v1077_v56 = vmax.f32 %v1013_v48, 0.0 }
 0x123   :  { %1106 = vst [vmem:[%s1775_s3 + $0xa0] sm:$0xff] %v1042_v51  ;;  %1138 = vst [vmem:[%s1775_s3 + $0x1a0] sm:$0xff] %v1074_v52  ;;  %v1043_v57 = vmax.f32 %v979_v53, 0.0  ;;  %v1075_v58 = vmax.f32 %v1011_v54, 0.0 }
 0x124   :  { %1109 = vst [vmem:[%s1775_s3 + $0xb8] sm:$0xff] %v1045_v55  ;;  %1141 = vst [vmem:[%s1775_s3 + $0x1b8] sm:$0xff] %v1077_v56 }
 0x125   :  { %1107 = vst [vmem:[%s1775_s3 + $0xa8] sm:$0xff] %v1043_v57  ;;  %1139 = vst [vmem:[%s1775_s3 + $0x1a8] sm:$0xff] %v1075_v58  ;;  %v1277_v59 = vpop.f32.mrb[24].mxu0  ;;  %v1309_v60 = vpop.f32.mrb[24].mxu1 }
 0x126   :  { %v984_v61 = vadd.f32 %v1277_v59, %v1514_v40  ;;  %v1016_v62 = vadd.f32 %v1309_v60, %v1514_v40  ;;  %v597_v63 = vpop.f32.mrb[25].mxu0  ;;  %v725_v0 = vpop.f32.mrb[25].mxu1 }
 0x127   :  { %v982_v1 = vadd.f32 %v1514_v40, %v597_v63  ;;  %v1014_v2 = vadd.f32 %v1514_v40, %v725_v0  ;;  %v1278_v3 = vpop.f32.mrb[26].mxu0  ;;  %v1310_v4 = vpop.f32.mrb[26].mxu1 }
 0x128   :  { %v1048_v5 = vmax.f32 %v984_v61, 0.0  ;;  %v1080_v6 = vmax.f32 %v1016_v62, 0.0  ;;  %v985_v7 = vadd.f32 %v1278_v3, %v1514_v40  ;;  %v1017_v8 = vadd.f32 %v1310_v4, %v1514_v40  ;;  %v600_v9 = vpop.f32.mrb[27].mxu0  ;;  %v728_v10 = vpop.f32.mrb[27].mxu1 }
 0x129   :  { %v1046_v11 = vmax.f32 %v982_v1, 0.0  ;;  %v1078_v12 = vmax.f32 %v1014_v2, 0.0  ;;  %v983_v13 = vadd.f32 %v1514_v40, %v600_v9  ;;  %v1015_v14 = vadd.f32 %v1514_v40, %v728_v10 }
 0x12a   :  { %1112 = vst [vmem:[%s1775_s3 + $0xd0] sm:$0xff] %v1048_v5  ;;  %1144 = vst [vmem:[%s1775_s3 + $0x1d0] sm:$0xff] %v1080_v6  ;;  %v1049_v15 = vmax.f32 %v985_v7, 0.0  ;;  %v1081_v16 = vmax.f32 %v1017_v8, 0.0 }
 0x12b   :  { %1110 = vst [vmem:[%s1775_s3 + $0xc0] sm:$0xff] %v1046_v11  ;;  %1142 = vst [vmem:[%s1775_s3 + $0x1c0] sm:$0xff] %v1078_v12  ;;  %v1047_v17 = vmax.f32 %v983_v13, 0.0  ;;  %v1079_v18 = vmax.f32 %v1015_v14, 0.0 }
 0x12c   :  { %1113 = vst [vmem:[%s1775_s3 + $0xd8] sm:$0xff] %v1049_v15  ;;  %1145 = vst [vmem:[%s1775_s3 + $0x1d8] sm:$0xff] %v1081_v16 }
 0x12d   :  { %1111 = vst [vmem:[%s1775_s3 + $0xc8] sm:$0xff] %v1047_v17  ;;  %1143 = vst [vmem:[%s1775_s3 + $0x1c8] sm:$0xff] %v1079_v18  ;;  %v1281_v19 = vpop.f32.mrb[28].mxu0  ;;  %v1313_v20 = vpop.f32.mrb[28].mxu1 }
 0x12e   :  { %v988_v21 = vadd.f32 %v1281_v19, %v1514_v40  ;;  %v1020_v22 = vadd.f32 %v1313_v20, %v1514_v40  ;;  %v613_v23 = vpop.f32.mrb[29].mxu0  ;;  %v741_v24 = vpop.f32.mrb[29].mxu1 }
 0x12f   :  { %v986_v25 = vadd.f32 %v1514_v40, %v613_v23  ;;  %v1018_v26 = vadd.f32 %v1514_v40, %v741_v24  ;;  %v1282_v27 = vpop.f32.mrb[30].mxu0  ;;  %v1314_v28 = vpop.f32.mrb[30].mxu1 }
 0x130   :  { %v1052_v29 = vmax.f32 %v988_v21, 0.0  ;;  %v1084_v30 = vmax.f32 %v1020_v22, 0.0  ;;  %v989_v31 = vadd.f32 %v1282_v27, %v1514_v40  ;;  %v1021_v32 = vadd.f32 %v1314_v28, %v1514_v40  ;;  %v616_v33 = vpop.f32.mrb[31].mxu0  ;;  %v744_v34 = vpop.f32.mrb[31].mxu1 }
 0x131   :  { %v1050_v35 = vmax.f32 %v986_v25, 0.0  ;;  %v1082_v36 = vmax.f32 %v1018_v26, 0.0  ;;  %v987_v37 = vadd.f32 %v1514_v40, %v616_v33  ;;  %v1019_v38 = vadd.f32 %v1514_v40, %v744_v34 }
 0x132   :  { %1116 = vst [vmem:[%s1775_s3 + $0xf0] sm:$0xff] %v1052_v29  ;;  %1148 = vst [vmem:[%s1775_s3 + $0x1f0] sm:$0xff] %v1084_v30  ;;  %v1053_v39 = vmax.f32 %v989_v31, 0.0  ;;  %v1085_v41 = vmax.f32 %v1021_v32, 0.0 }
 0x133   :  { %1114 = vst [vmem:[%s1775_s3 + $0xe0] sm:$0xff] %v1050_v35  ;;  %1146 = vst [vmem:[%s1775_s3 + $0x1e0] sm:$0xff] %v1082_v36  ;;  %v1051_v42 = vmax.f32 %v987_v37, 0.0  ;;  %v1083_v40 = vmax.f32 %v1019_v38, 0.0 }
 0x134   :  { %1117 = vst [vmem:[%s1775_s3 + $0xf8] sm:$0xff] %v1053_v39  ;;  %1149 = vst [vmem:[%s1775_s3 + $0x1f8] sm:$0xff] %v1085_v41 }
 0x135   :  { %1115 = vst [vmem:[%s1775_s3 + $0xe8] sm:$0xff] %v1051_v42  ;;  %1147 = vst [vmem:[%s1775_s3 + $0x1e8] sm:$0xff] %v1083_v40 }

// kernel: dsesc_forward.6
= control target key start
LH: loop header
LB: loop body
LE: loop exit
PB: predicated region body
PF: predicated region fallthrough
CT: control target
= control target key end

     0   :  { %s602_s1 = inlined_call_operand.vmem [shape: bf16[128,128], index: 1, kind: input, shape index: {}]   ;;  %s603_s0 = inlined_call_operand.vmem [shape: bf16[128,128], index: 0, kind: input, shape index: {}]   ;;  %s604_s2 = inlined_call_operand.vmem [shape: f32[1,128], index: 2, kind: input, shape index: {}]   ;;  %s605_s3 = inlined_call_operand.vmem [shape: f32[128,128], index: 3, kind: output, shape index: {}]  }
   0x1   :  { %v467_v0 = vld [vmem:[%s602_s1] sm:$0xff]   ;;  %v468_v1 = vld [vmem:[%s602_s1 + $0x8] sm:$0xff]   ;;  %v469_v2 = vld [vmem:[%s602_s1 + $0x10] sm:$0xff]  }
   0x2   :  { %419 = vmatprep.subr.bf16.mxu0 %v467_v0  ;;  %451 = vmatprep.subr.bf16.mxu1 %v467_v0  ;;  %v470_v3 = vld [vmem:[%s602_s1 + $0x18] sm:$0xff]   ;;  %v475_v4 = vld [vmem:[%s603_s0] sm:$0xff]   ;;  %v472_v7 = vld [vmem:[%s602_s1 + $0x28] sm:$0xff]  }
   0x3   :  { %420 = vmatpush3.bf16.msra.mxu0 %v467_v0  ;;  %459 = vmatpush3.bf16.msra.mxu1 %v467_v0  ;;  %v476_v5 = vld [vmem:[%s603_s0 + $0x20] sm:$0xff]   ;;  %v473_v8 = vld [vmem:[%s602_s1 + $0x30] sm:$0xff]   ;;  %v474_v9 = vld [vmem:[%s602_s1 + $0x38] sm:$0xff]  }
   0x4   :  { %421 = vmatprep.subr.bf16.mxu0 %v468_v1  ;;  %452 = vmatprep.subr.bf16.mxu1 %v468_v1  ;;  %v471_v6 = vld [vmem:[%s602_s1 + $0x20] sm:$0xff]   ;;  %v477_v10 = vld [vmem:[%s603_s0 + $0x8] sm:$0xff]   ;;  %v479_v12 = vld [vmem:[%s603_s0 + $0x10] sm:$0xff]  }
   0x5   :  { %435 = vmatprep.mubr.bf16.mxu0 %v475_v4  ;;  %443 = vmatprep.mubr.bf16.mxu1 %v476_v5  ;;  %v478_v11 = vld [vmem:[%s603_s0 + $0x28] sm:$0xff]   ;;  %v480_v13 = vld [vmem:[%s603_s0 + $0x30] sm:$0xff]   ;;  %v481_v14 = vld [vmem:[%s603_s0 + $0x18] sm:$0xff]  }
   0x6   :  { %v482_v15 = vld [vmem:[%s603_s0 + $0x38] sm:$0xff]   ;;  %v402_v16 = vld [vmem:[%s604_s2] ss:$0 sm:$0xff] }
   0x7   :  { %422 = vmatpush3.bf16.msra.mxu0 %v468_v1  ;;  %460 = vmatpush3.bf16.msra.mxu1 %v468_v1 }
   0x8   :  { %423 = vmatprep.subr.bf16.mxu0 %v469_v2  ;;  %453 = vmatprep.subr.bf16.mxu1 %v469_v2 }
   0xb   :  { %424 = vmatpush3.bf16.msra.mxu0 %v469_v2  ;;  %461 = vmatpush3.bf16.msra.mxu1 %v469_v2 }
   0xc   :  { %425 = vmatprep.subr.bf16.mxu0 %v470_v3  ;;  %454 = vmatprep.subr.bf16.mxu1 %v470_v3 }
   0xf   :  { %426 = vmatpush3.bf16.msra.mxu0 %v470_v3  ;;  %462 = vmatpush3.bf16.msra.mxu1 %v470_v3 }
  0x10   :  { %427 = vmatprep.subr.bf16.mxu0 %v471_v6  ;;  %455 = vmatprep.subr.bf16.mxu1 %v471_v6 }
  0x13   :  { %428 = vmatpush3.bf16.msra.mxu0 %v471_v6  ;;  %463 = vmatpush3.bf16.msra.mxu1 %v471_v6 }
  0x14   :  { %429 = vmatprep.subr.bf16.mxu0 %v472_v7  ;;  %456 = vmatprep.subr.bf16.mxu1 %v472_v7 }
  0x17   :  { %430 = vmatpush3.bf16.msra.mxu0 %v472_v7  ;;  %464 = vmatpush3.bf16.msra.mxu1 %v472_v7 }
  0x18   :  { %431 = vmatprep.subr.bf16.mxu0 %v473_v8  ;;  %457 = vmatprep.subr.bf16.mxu1 %v473_v8 }
  0x1b   :  { %432 = vmatpush3.bf16.msra.mxu0 %v473_v8  ;;  %465 = vmatpush3.bf16.msra.mxu1 %v473_v8 }
  0x1c   :  { %433 = vmatprep.subr.bf16.mxu0 %v474_v9  ;;  %458 = vmatprep.subr.bf16.mxu1 %v474_v9 }
  0x1f   :  { %434 = vmatpush3.bf16.msra.mxu0 %v474_v9  ;;  %466 = vmatpush3.bf16.msra.mxu1 %v474_v9 }
  0x22   :  { %436 = vmatmul.mubr.bf16.vlgmr.msra.gmra.mrb[0].mxu0 %v477_v10  ;;  %444 = vmatmul.mubr.bf16.vlgmr.msra.gmra.mrb[0].mxu1 %v478_v11 }
  0x23   :  { %439 = vmatprep.mubr.bf16.mxu0 %v479_v12  ;;  %447 = vmatprep.mubr.bf16.mxu1 %v480_v13 }
  0x2a   :  { %440 = vmatmul.mubr.bf16.gmra.mrb[4].mxu0 %v481_v14  ;;  %448 = vmatmul.mubr.bf16.gmra.mrb[4].mxu1 %v482_v15 }
  0xf5   :  { %v437_v17 = vpop.f32.mrb[0].mxu0  ;;  %v445_v18 = vpop.f32.mrb[0].mxu1 }
  0xf6   :  { %v336_v19 = vadd.f32 %v437_v17, %v402_v16  ;;  %v344_v20 = vadd.f32 %v445_v18, %v402_v16  ;;  %v213_v21 = vpop.f32.mrb[1].mxu0  ;;  %v245_v22 = vpop.f32.mrb[1].mxu1 }
  0xf7   :  { %v334_v23 = vadd.f32 %v402_v16, %v213_v21  ;;  %v342_v24 = vadd.f32 %v402_v16, %v245_v22  ;;  %v438_v25 = vpop.f32.mrb[2].mxu0  ;;  %v446_v26 = vpop.f32.mrb[2].mxu1 }
  0xf8   :  { %v352_v27 = vmax.f32 %v336_v19, 0.0  ;;  %v360_v28 = vmax.f32 %v344_v20, 0.0  ;;  %v337_v29 = vadd.f32 %v438_v25, %v402_v16  ;;  %v345_v30 = vadd.f32 %v446_v26, %v402_v16  ;;  %v216_v31 = vpop.f32.mrb[3].mxu0  ;;  %v248_v32 = vpop.f32.mrb[3].mxu1 }
  0xf9   :  { %v350_v33 = vmax.f32 %v334_v23, 0.0  ;;  %v358_v34 = vmax.f32 %v342_v24, 0.0  ;;  %v335_v35 = vadd.f32 %v402_v16, %v216_v31  ;;  %v343_v36 = vadd.f32 %v402_v16, %v248_v32 }
  0xfa   :  { %368 = vst [vmem:[%s605_s3 + $0x10] sm:$0xff] %v352_v27  ;;  %376 = vst [vmem:[%s605_s3 + $0x50] sm:$0xff] %v360_v28  ;;  %v353_v37 = vmax.f32 %v337_v29, 0.0  ;;  %v361_v38 = vmax.f32 %v345_v30, 0.0 }
  0xfb   :  { %366 = vst [vmem:[%s605_s3] sm:$0xff] %v350_v33  ;;  %374 = vst [vmem:[%s605_s3 + $0x40] sm:$0xff] %v358_v34  ;;  %v351_v39 = vmax.f32 %v335_v35, 0.0  ;;  %v359_v40 = vmax.f32 %v343_v36, 0.0 }
  0xfc   :  { %369 = vst [vmem:[%s605_s3 + $0x18] sm:$0xff] %v353_v37  ;;  %377 = vst [vmem:[%s605_s3 + $0x58] sm:$0xff] %v361_v38 }
  0xfd   :  { %367 = vst [vmem:[%s605_s3 + $0x8] sm:$0xff] %v351_v39  ;;  %375 = vst [vmem:[%s605_s3 + $0x48] sm:$0xff] %v359_v40  ;;  %v441_v41 = vpop.f32.mrb[4].mxu0  ;;  %v449_v42 = vpop.f32.mrb[4].mxu1 }
  0xfe   :  { %v340_v43 = vadd.f32 %v441_v41, %v402_v16  ;;  %v348_v44 = vadd.f32 %v449_v42, %v402_v16  ;;  %v229_v45 = vpop.f32.mrb[5].mxu0  ;;  %v261_v46 = vpop.f32.mrb[5].mxu1 }
  0xff   :  { %v338_v47 = vadd.f32 %v402_v16, %v229_v45  ;;  %v346_v48 = vadd.f32 %v402_v16, %v261_v46  ;;  %v442_v49 = vpop.f32.mrb[6].mxu0  ;;  %v450_v50 = vpop.f32.mrb[6].mxu1 }
 0x100   :  { %v356_v51 = vmax.f32 %v340_v43, 0.0  ;;  %v364_v52 = vmax.f32 %v348_v44, 0.0  ;;  %v341_v53 = vadd.f32 %v442_v49, %v402_v16  ;;  %v349_v54 = vadd.f32 %v450_v50, %v402_v16  ;;  %v232_v55 = vpop.f32.mrb[7].mxu0  ;;  %v264_v56 = vpop.f32.mrb[7].mxu1 }
 0x101   :  { %v354_v57 = vmax.f32 %v338_v47, 0.0  ;;  %v362_v58 = vmax.f32 %v346_v48, 0.0  ;;  %v339_v59 = vadd.f32 %v402_v16, %v232_v55  ;;  %v347_v60 = vadd.f32 %v402_v16, %v264_v56 }
 0x102   :  { %372 = vst [vmem:[%s605_s3 + $0x30] sm:$0xff] %v356_v51  ;;  %380 = vst [vmem:[%s605_s3 + $0x70] sm:$0xff] %v364_v52  ;;  %v357_v61 = vmax.f32 %v341_v53, 0.0  ;;  %v365_v62 = vmax.f32 %v349_v54, 0.0 }
 0x103   :  { %370 = vst [vmem:[%s605_s3 + $0x20] sm:$0xff] %v354_v57  ;;  %378 = vst [vmem:[%s605_s3 + $0x60] sm:$0xff] %v362_v58  ;;  %v355_v63 = vmax.f32 %v339_v59, 0.0  ;;  %v363_v0 = vmax.f32 %v347_v60, 0.0 }
 0x104   :  { %373 = vst [vmem:[%s605_s3 + $0x38] sm:$0xff] %v357_v61  ;;  %381 = vst [vmem:[%s605_s3 + $0x78] sm:$0xff] %v365_v62 }
 0x105   :  { %371 = vst [vmem:[%s605_s3 + $0x28] sm:$0xff] %v355_v63  ;;  %379 = vst [vmem:[%s605_s3 + $0x68] sm:$0xff] %v363_v0 }

// kernel: dsesc_forward.7
= control target key start
LH: loop header
LB: loop body
LE: loop exit
PB: predicated region body
PF: predicated region fallthrough
CT: control target
= control target key end

     0   :  { %v48_v0 = vlaneseq  ;;  %s756_s1 = inlined_call_operand.vmem [shape: bf16[128,128], index: 1, kind: input, shape index: {}]   ;;  %s757_s0 = inlined_call_operand.vmem [shape: bf16[128,128], index: 0, kind: input, shape index: {}]   ;;  %s758_s2 = inlined_call_operand.vmem [shape: f32[128,128], index: 2, kind: output, shape index: {}]  }
   0x1   :  { %v511_v1 = vld [vmem:[%s756_s1] sm:$0xff]   ;;  %v512_v2 = vld [vmem:[%s756_s1 + $0x8] sm:$0xff]   ;;  %v513_v6 = vld [vmem:[%s756_s1 + $0x10] sm:$0xff]  }
   0x2   :  { %v540_v3 = vshrl.u32 %v48_v0, 7  ;;  %463 = vmatprep.subr.bf16.mxu0 %v511_v1  ;;  %495 = vmatprep.subr.bf16.mxu1 %v511_v1  ;;  %v542_v4 = vand.u32 127, %v48_v0  ;;  %v514_v9 = vld [vmem:[%s756_s1 + $0x18] sm:$0xff]   ;;  %v32_v10 = vld [vmem:[%s757_s0] sm:$0xf]  ;;  %v516_v26 = vld [vmem:[%s756_s1 + $0x28] sm:$0xff]  }
   0x3   :  { %464 = vmatpush3.bf16.msra.mxu0 %v511_v1  ;;  %503 = vmatpush3.bf16.msra.mxu1 %v511_v1  ;;  %v33_v11 = vld [vmem:[%s757_s0 + $0x4] sm:$0xf]  ;;  %v40_v13 = vld [vmem:[%s757_s0 + $0x20] sm:$0xf]  ;;  %v517_v32 = vld [vmem:[%s756_s1 + $0x30] sm:$0xff]  }
   0x4   :  { %v50_v5 = vadd.s32 8, %v540_v3  ;;  %465 = vmatprep.subr.bf16.mxu0 %v512_v2  ;;  %496 = vmatprep.subr.bf16.mxu1 %v512_v2  ;;  %v57_v7 = vadd.s32 64, %v540_v3  ;;  %vm68_vm0 = vcmp.eq.s32.totalorder %v540_v3, %v542_v4  ;;  %v58_v8 = vadd.s32 72, %v540_v3  ;;  %v41_v14 = vld [vmem:[%s757_s0 + $0x24] sm:$0xf]  ;;  %v518_v35 = vld [vmem:[%s756_s1 + $0x38] sm:$0xff]  }
   0x5   :  { %vm103_vm3 = vmpackc.low %vm68_vm0, %vm68_vm0  ;;  %v51_v18 = vadd.s32 16, %v540_v3  ;;  %v515_v19 = vld [vmem:[%s756_s1 + $0x20] sm:$0xff]   ;;  %v52_v21 = vadd.s32 24, %v540_v3  ;;  %v59_v23 = vadd.s32 80, %v540_v3  ;;  %v60_v24 = vadd.s32 88, %v540_v3 }
   0x6   :  { %vm69_vm1 = vcmp.eq.s32.totalorder %v50_v5, %v542_v4  ;;  %vm76_vm2 = vcmp.eq.s32.totalorder %v57_v7, %v542_v4  ;;  %vm77_vm4 = vcmp.eq.s32.totalorder %v58_v8, %v542_v4  ;;  %v119_v12 = vsel %vm103_vm3, 0, %v32_v10  ;;  %v34_v36 = vld [vmem:[%s757_s0 + $0x8] sm:$0xf]  ;;  %v35_v37 = vld [vmem:[%s757_s0 + $0xc] sm:$0xf] }
   0x7   :  { %466 = vmatpush3.bf16.msra.mxu0 %v512_v2  ;;  %504 = vmatpush3.bf16.msra.mxu1 %v512_v2  ;;  %vm104_vm5 = vmpackc.low %vm69_vm1, %vm69_vm1  ;;  %vm70_vm8 = vcmp.eq.s32.totalorder %v51_v18, %v542_v4  ;;  %v53_v25 = vadd.s32 32, %v540_v3  ;;  %vm71_vm9 = vcmp.eq.s32.totalorder %v52_v21, %v542_v4  ;;  %v54_v27 = vadd.s32 40, %v540_v3  ;;  %v42_v40 = vld [vmem:[%s757_s0 + $0x28] sm:$0xf]  ;;  %v43_v41 = vld [vmem:[%s757_s0 + $0x2c] sm:$0xf] }
   0x8   :  { %467 = vmatprep.subr.bf16.mxu0 %v513_v6  ;;  %497 = vmatprep.subr.bf16.mxu1 %v513_v6  ;;  %v120_v15 = vsel %vm104_vm5, 0, %v33_v11  ;;  %vm111_vm6 = vmpackc.low %vm76_vm2, %vm76_vm2  ;;  %vm78_vm10 = vcmp.eq.s32.totalorder %v59_v23, %v542_v4  ;;  %v61_v28 = vadd.s32 96, %v540_v3  ;;  %vm79_vm12 = vcmp.eq.s32.totalorder %v60_v24, %v542_v4  ;;  %v36_v44 = vld [vmem:[%s757_s0 + $0x10] sm:$0xf]  ;;  %v37_v45 = vld [vmem:[%s757_s0 + $0x14] sm:$0xf] }
   0x9   :  { %v431_v16 = vcombine.low %v119_v12, %v120_v15  ;;  %vm112_vm7 = vmpackc.low %vm77_vm4, %vm77_vm4  ;;  %v127_v17 = vsel %vm111_vm6, 0, %v40_v13  ;;  %v62_v30 = vadd.s32 104, %v540_v3  ;;  %vm72_vm14 = vcmp.eq.s32.totalorder %v53_v25, %v542_v4  ;;  %v44_v48 = vld [vmem:[%s757_s0 + $0x30] sm:$0xf]  ;;  %v45_v49 = vld [vmem:[%s757_s0 + $0x34] sm:$0xf] }
   0xa   :  { %v128_v20 = vsel %vm112_vm7, 0, %v41_v14  ;;  %vm586_vm11 = vmpackc.low %vm70_vm8, %vm70_vm8  ;;  %vm73_vm0 = vcmp.eq.s32.totalorder %v54_v27, %v542_v4  ;;  %vm80_vm2 = vcmp.eq.s32.totalorder %v61_v28, %v542_v4  ;;  %v55_v39 = vadd.s32 48, %v540_v3  ;;  %v38_v2 = vld [vmem:[%s757_s0 + $0x18] sm:$0xf]  ;;  %v47_v5 = vld [vmem:[%s757_s0 + $0x3c] sm:$0xf] }
   0xb   :  { %468 = vmatpush3.bf16.msra.mxu0 %v513_v6  ;;  %505 = vmatpush3.bf16.msra.mxu1 %v513_v6  ;;  %v435_v22 = vcombine.low %v127_v17, %v128_v20  ;;  %vm592_vm13 = vmpackc.low %vm71_vm9, %vm71_vm9  ;;  %vm81_vm4 = vcmp.eq.s32.totalorder %v62_v30, %v542_v4  ;;  %v56_v43 = vadd.s32 56, %v540_v3  ;;  %v63_v47 = vadd.s32 112, %v540_v3 }
   0xc   :  { %469 = vmatprep.subr.bf16.mxu0 %v514_v9  ;;  %498 = vmatprep.subr.bf16.mxu1 %v514_v9  ;;  %vm600_vm15 = vmpackc.low %vm78_vm10, %vm78_vm10  ;;  %v64_v51 = vadd.s32 120, %v540_v3  ;;  %v121_v52 = vsel %vm586_vm11, 0, %v34_v36  ;;  %v122_v53 = vsel %vm592_vm13, 0, %v35_v37  ;;  %vm74_vm8 = vcmp.eq.s32.totalorder %v55_v39, %v542_v4  ;;  %v39_v3 = vld [vmem:[%s757_s0 + $0x1c] sm:$0xf] }
   0xd   :  { %479 = vmatprep.mubr.bf16.mxu0 %v431_v16  ;;  %487 = vmatprep.mubr.bf16.mxu1 %v435_v22  ;;  %vm605_vm1 = vmpackc.low %vm79_vm12, %vm79_vm12  ;;  %v129_v54 = vsel %vm600_vm15, 0, %v42_v40  ;;  %vm75_vm9 = vcmp.eq.s32.totalorder %v56_v43, %v542_v4  ;;  %vm82_vm10 = vcmp.eq.s32.totalorder %v63_v47, %v542_v4  ;;  %v432_v61 = vcombine.low %v121_v52, %v122_v53 }
   0xe   :  { %vm619_vm3 = vmpackc.low %vm72_vm14, %vm72_vm14  ;;  %v130_v55 = vsel %vm605_vm1, 0, %v43_v41  ;;  %vm83_vm12 = vcmp.eq.s32.totalorder %v64_v51, %v542_v4  ;;  %v46_v4 = vld [vmem:[%s757_s0 + $0x38] sm:$0xf] }
   0xf   :  { %470 = vmatpush3.bf16.msra.mxu0 %v514_v9  ;;  %506 = vmatpush3.bf16.msra.mxu1 %v514_v9  ;;  %vm631_vm5 = vmpackc.low %vm73_vm0, %vm73_vm0  ;;  %v123_v56 = vsel %vm619_vm3, 0, %v36_v44  ;;  %v436_v62 = vcombine.low %v129_v54, %v130_v55 }
  0x10   :  { %471 = vmatprep.subr.bf16.mxu0 %v515_v19  ;;  %499 = vmatprep.subr.bf16.mxu1 %v515_v19  ;;  %vm645_vm6 = vmpackc.low %vm80_vm2, %vm80_vm2  ;;  %v124_v57 = vsel %vm631_vm5, 0, %v37_v45 }
  0x11   :  { %vm659_vm7 = vmpackc.low %vm81_vm4, %vm81_vm4  ;;  %v131_v58 = vsel %vm645_vm6, 0, %v44_v48  ;;  %v433_v0 = vcombine.low %v123_v56, %v124_v57 }
  0x12   :  { %v132_v59 = vsel %vm659_vm7, 0, %v45_v49  ;;  %vm683_vm11 = vmpackc.low %vm74_vm8, %vm74_vm8 }
  0x13   :  { %472 = vmatpush3.bf16.msra.mxu0 %v515_v19  ;;  %507 = vmatpush3.bf16.msra.mxu1 %v515_v19  ;;  %vm688_vm13 = vmpackc.low %vm75_vm9, %vm75_vm9  ;;  %v437_v1 = vcombine.low %v131_v58, %v132_v59  ;;  %v125_v6 = vsel %vm683_vm11, 0, %v38_v2 }
  0x14   :  { %473 = vmatprep.subr.bf16.mxu0 %v516_v26  ;;  %500 = vmatprep.subr.bf16.mxu1 %v516_v26  ;;  %vm117_vm14 = vmpackc.low %vm82_vm10, %vm82_vm10  ;;  %v126_v7 = vsel %vm688_vm13, 0, %v39_v3 }
  0x15   :  { %vm118_vm15 = vmpackc.low %vm83_vm12, %vm83_vm12  ;;  %v133_v8 = vsel %vm117_vm14, 0, %v46_v4  ;;  %v434_v10 = vcombine.low %v125_v6, %v126_v7 }
  0x16   :  { %v134_v9 = vsel %vm118_vm15, 0, %v47_v5 }
  0x17   :  { %474 = vmatpush3.bf16.msra.mxu0 %v516_v26  ;;  %508 = vmatpush3.bf16.msra.mxu1 %v516_v26  ;;  %v438_v11 = vcombine.low %v133_v8, %v134_v9 }
  0x18   :  { %475 = vmatprep.subr.bf16.mxu0 %v517_v32  ;;  %501 = vmatprep.subr.bf16.mxu1 %v517_v32 }
  0x1b   :  { %476 = vmatpush3.bf16.msra.mxu0 %v517_v32  ;;  %509 = vmatpush3.bf16.msra.mxu1 %v517_v32 }
  0x1c   :  { %477 = vmatprep.subr.bf16.mxu0 %v518_v35  ;;  %502 = vmatprep.subr.bf16.mxu1 %v518_v35 }
  0x1f   :  { %478 = vmatpush3.bf16.msra.mxu0 %v518_v35  ;;  %510 = vmatpush3.bf16.msra.mxu1 %v518_v35 }
  0x22   :  { %480 = vmatmul.mubr.bf16.vlgmr.msra.gmra.mrb[0].mxu0 %v432_v61  ;;  %488 = vmatmul.mubr.bf16.vlgmr.msra.gmra.mrb[0].mxu1 %v436_v62 }
  0x23   :  { %483 = vmatprep.mubr.bf16.mxu0 %v433_v0  ;;  %491 = vmatprep.mubr.bf16.mxu1 %v437_v1 }
  0x2a   :  { %484 = vmatmul.mubr.bf16.gmra.mrb[4].mxu0 %v434_v10  ;;  %492 = vmatmul.mubr.bf16.gmra.mrb[4].mxu1 %v438_v11 }
  0xf5   :  { %v481_v12 = vpop.f32.mrb[0].mxu0  ;;  %v489_v13 = vpop.f32.mrb[0].mxu1 }
  0xf6   :  { %413 = vst [vmem:[%s758_s2 + $0x10] sm:$0xff] %v481_v12  ;;  %421 = vst [vmem:[%s758_s2 + $0x50] sm:$0xff] %v489_v13  ;;  %v297_v14 = vpop.f32.mrb[1].mxu0  ;;  %v329_v15 = vpop.f32.mrb[1].mxu1 }
  0xf7   :  { %411 = vst [vmem:[%s758_s2] sm:$0xff] %v297_v14  ;;  %419 = vst [vmem:[%s758_s2 + $0x40] sm:$0xff] %v329_v15  ;;  %v482_v16 = vpop.f32.mrb[2].mxu0  ;;  %v490_v17 = vpop.f32.mrb[2].mxu1 }
  0xf8   :  { %414 = vst [vmem:[%s758_s2 + $0x18] sm:$0xff] %v482_v16  ;;  %422 = vst [vmem:[%s758_s2 + $0x58] sm:$0xff] %v490_v17  ;;  %v300_v18 = vpop.f32.mrb[3].mxu0  ;;  %v332_v19 = vpop.f32.mrb[3].mxu1 }
  0xf9   :  { %412 = vst [vmem:[%s758_s2 + $0x8] sm:$0xff] %v300_v18  ;;  %420 = vst [vmem:[%s758_s2 + $0x48] sm:$0xff] %v332_v19 }
  0xfd   :  { %v485_v20 = vpop.f32.mrb[4].mxu0  ;;  %v493_v21 = vpop.f32.mrb[4].mxu1 }
  0xfe   :  { %417 = vst [vmem:[%s758_s2 + $0x30] sm:$0xff] %v485_v20  ;;  %425 = vst [vmem:[%s758_s2 + $0x70] sm:$0xff] %v493_v21  ;;  %v313_v22 = vpop.f32.mrb[5].mxu0  ;;  %v345_v23 = vpop.f32.mrb[5].mxu1 }
  0xff   :  { %415 = vst [vmem:[%s758_s2 + $0x20] sm:$0xff] %v313_v22  ;;  %423 = vst [vmem:[%s758_s2 + $0x60] sm:$0xff] %v345_v23  ;;  %v486_v24 = vpop.f32.mrb[6].mxu0  ;;  %v494_v25 = vpop.f32.mrb[6].mxu1 }
 0x100   :  { %418 = vst [vmem:[%s758_s2 + $0x38] sm:$0xff] %v486_v24  ;;  %426 = vst [vmem:[%s758_s2 + $0x78] sm:$0xff] %v494_v25  ;;  %v316_v26 = vpop.f32.mrb[7].mxu0  ;;  %v348_v27 = vpop.f32.mrb[7].mxu1 }
 0x101   :  { %416 = vst [vmem:[%s758_s2 + $0x28] sm:$0xff] %v316_v26  ;;  %424 = vst [vmem:[%s758_s2 + $0x68] sm:$0xff] %v348_v27 }

// kernel: tile.13
= control target key start
LH: loop header
LB: loop body
LE: loop exit
PB: predicated region body
PF: predicated region fallthrough
CT: control target
= control target key end

     0   :  { %s22_s0 = inlined_call_operand.vmem [shape: f32[4], index: 0, kind: input, shape index: {}]   ;;  %s23_s1 = inlined_call_operand.vmem [shape: f32[4,4], index: 1, kind: output, shape index: {}]  }
   0x1   :  { %v4_v0 = vld [vmem:[%s22_s0] ss:$0 sm:$0xff] }
   0x2   :  { %5 = vst [vmem:[%s23_s1] sm:$0xf] %v4_v0 }

// kernel: tile.14
= control target key start
LH: loop header
LB: loop body
LE: loop exit
PB: predicated region body
PF: predicated region fallthrough
CT: control target
= control target key end

     0   :  { %vm7_vm0 = vcmask 31744   ;;  %s37_s8 = smov 4   ;;  %s38_s9 = smov 8   ;;  %vm13_vm1 = vcmask 130144   ;;  %vm19_vm2 = vcmask 97344   ;;  %vm25_vm3 = vcmask 64544   ;;  %s55_s0 = inlined_call_operand.vmem [shape: f32[4,4], index: 0, kind: input, shape index: {}]   ;;  %s56_s1 = inlined_call_operand.vmem [shape: f32[16], index: 1, kind: output, shape index: {}]  }
   0x1   :  { %v4_v0 = vld [vmem:[%s55_s0] sm:$0xf]  ;;  %s36_s0 = smov 12  }
   0x2   :  { %5 = vst [vmem:[#allocation1] sm:$0xf] %v4_v0 }
   0x9   :  { %v10_v1 = vld [vmem:[#allocation1 + $0x3] sm:$0x1]   ;;  %v22_v2 = vld [vmem:[#allocation1 + $0x1] sm:$0x1]   ;;  %v6_v3 = vld [vmem:[#allocation1] sm:$0x1]  }
   0xa   :  { %11 = vrot.lane.b32.xlu0 %v10_v1, %s36_s0  ;;  %23 = vrot.lane.b32.xlu1 %v22_v2, %s37_s8  ;;  %v16_v4 = vld [vmem:[#allocation1 + $0x2] sm:$0x1]   ;;  %8 = vst.msk [vmem:[#allocation0] sm:$0x1] %vm7_vm0, %v6_v3  }
   0xe   :  { %17 = vrot.lane.b32.xlu0 %v16_v4, %s38_s9 }
  0x7c   :  { %v12_v5 = vpop.permute.xlu0 %11   ;;  %v24_v6 = vpop.permute.xlu1 %23  }
  0x7d   :  { %14 = vst.msk [vmem:[#allocation0] sm:$0x1] %vm13_vm1, %v12_v5  }
  0x80   :  { %v18_v7 = vpop.permute.xlu0 %17  }
  0x81   :  { %20 = vst.msk [vmem:[#allocation0] sm:$0x1] %vm19_vm2, %v18_v7  }
  0x82   :  { %26 = vst.msk [vmem:[#allocation0] sm:$0x1] %vm25_vm3, %v24_v6  }
  0x89   :  { %v30_v8 = vld [vmem:[#allocation0] sm:$0x1] }
  0x8a   :  { %32 = vst [vmem:[%s56_s1] sm:$0x1] %v30_v8 }

// kernel: tile.18
= control target key start
LH: loop header
LB: loop body
LE: loop exit
PB: predicated region body
PF: predicated region fallthrough
CT: control target
= control target key end

     0   :  { %s22_s0 = inlined_call_operand.vmem [shape: f32[3], index: 0, kind: input, shape index: {}]   ;;  %s23_s1 = inlined_call_operand.vmem [shape: f32[4,3], index: 1, kind: output, shape index: {}]  }
   0x1   :  { %v4_v0 = vld [vmem:[%s22_s0] ss:$0 sm:$0xff] }
   0x2   :  { %5 = vst [vmem:[%s23_s1] sm:$0xf] %v4_v0 }

// kernel: tile.19
= control target key start
LH: loop header
LB: loop body
LE: loop exit
PB: predicated region body
PF: predicated region fallthrough
CT: control target
= control target key end

     0   :  { %vm7_vm0 = vcmask 23552   ;;  %s37_s8 = smov 3   ;;  %s38_s9 = smov 6   ;;  %vm13_vm1 = vcmask 97352   ;;  %vm19_vm2 = vcmask 72752   ;;  %vm25_vm3 = vcmask 48152   ;;  %s55_s0 = inlined_call_operand.vmem [shape: f32[4,3], index: 0, kind: input, shape index: {}]   ;;  %s56_s1 = inlined_call_operand.vmem [shape: f32[12], index: 1, kind: output, shape index: {}]  }
   0x1   :  { %v4_v0 = vld [vmem:[%s55_s0] sm:$0xf]  ;;  %s36_s0 = smov 9  }
   0x2   :  { %5 = vst [vmem:[#allocation1] sm:$0xf] %v4_v0 }
   0x9   :  { %v10_v1 = vld [vmem:[#allocation1 + $0x3] sm:$0x1]   ;;  %v22_v2 = vld [vmem:[#allocation1 + $0x1] sm:$0x1]   ;;  %v6_v3 = vld [vmem:[#allocation1] sm:$0x1]  }
   0xa   :  { %11 = vrot.lane.b32.xlu0 %v10_v1, %s36_s0  ;;  %23 = vrot.lane.b32.xlu1 %v22_v2, %s37_s8  ;;  %v16_v4 = vld [vmem:[#allocation1 + $0x2] sm:$0x1]   ;;  %8 = vst.msk [vmem:[#allocation0] sm:$0x1] %vm7_vm0, %v6_v3  }
   0xe   :  { %17 = vrot.lane.b32.xlu0 %v16_v4, %s38_s9 }
  0x7c   :  { %v12_v5 = vpop.permute.xlu0 %11   ;;  %v24_v6 = vpop.permute.xlu1 %23  }
  0x7d   :  { %14 = vst.msk [vmem:[#allocation0] sm:$0x1] %vm13_vm1, %v12_v5  }
  0x80   :  { %v18_v7 = vpop.permute.xlu0 %17  }
  0x81   :  { %20 = vst.msk [vmem:[#allocation0] sm:$0x1] %vm19_vm2, %v18_v7  }
  0x82   :  { %26 = vst.msk [vmem:[#allocation0] sm:$0x1] %vm25_vm3, %v24_v6  }
  0x89   :  { %v30_v8 = vld [vmem:[#allocation0] sm:$0x1] }
  0x8a   :  { %32 = vst [vmem:[%s56_s1] sm:$0x1] %v30_v8 }

</bundles_post_ra>
